<compile_context>
chip_gen: v6e
topology: v6e:2x2x1
jax: 0.10.0
libtpu: 0.0.40
codegen_flags: <defaults>
</compile_context>

<pallas_src>
import math
from functools import partial

import jax
import jax.numpy as jnp
from jax.experimental import pallas as pl
from jax.experimental.pallas import tpu as pltpu


# ---------------------------------------------------------------------------
# Kernels
# ---------------------------------------------------------------------------
def _mqa_single_pass_kernel(x_ref, wq_ref, bq_ref, wk_ref, bk_ref, wv_ref,
                            bv_ref, wo_ref, bo_ref, o_ref, *,
                            seq_len, num_heads, head_dim, approx_recip):
    """One batch-block (Bb batch elements, full sequence) per grid step.

    x_ref : (Bb*S, C_in)           wq_ref: (C_in, H*D) head-major columns
    wk/wv : (C_in, D)              wo_ref: (H, D, C_out) per-head slabs
    bq/bk/bv/bo: (1, ...) f32      o_ref : (Bb*S, C_out)
    """
    S, H, D = seq_len, num_heads, head_dim
    M = x_ref.shape[0]
    Bb = M // S
    dt = x_ref.dtype                       # MXU input dtype; accumulate f32

    x2 = x_ref[...]

    # Projections (1/sqrt(D) already folded into wq/bq by the wrapper).
    q2 = jnp.dot(x2, wq_ref[...], preferred_element_type=jnp.float32) + bq_ref[...]
    k2 = jnp.dot(x2, wk_ref[...], preferred_element_type=jnp.float32) + bk_ref[...]
    v2 = jnp.dot(x2, wv_ref[...], preferred_element_type=jnp.float32) + bv_ref[...]

    k3 = k2.reshape(Bb, S, D).astype(dt)                       # (Bb, S, D)
    v3 = v2.reshape(Bb, S, D).astype(dt)                       # (Bb, S, D)

    # Fold all heads into the row axis: row m = h*S + s.
    # TODO(synk): try a pltpu.einshape-based relayout (XLU) instead of the
    #             lane-slice + sublane-concat and compare in the bundle dump.
    q3 = jnp.concatenate(
        [q2[:, h * D:(h + 1) * D].reshape(Bb, S, D) for h in range(H)],
        axis=1).astype(dt)                                     # (Bb, H*S, D)

    # All heads of a batch element in one batched matmul (no explicit k.T,
    # no score scaling).
    s = jnp.einsum('bmd,btd->bmt', q3, k3,
                   preferred_element_type=jnp.float32)         # (Bb, H*S, S)
    s = s - jnp.max(s, axis=-1, keepdims=True)
    e = jnp.exp(s)
    denom = jnp.sum(e, axis=-1, keepdims=True)
    if approx_recip:
        p = e * pl.reciprocal(denom, approx=True)
    else:
        p = e / denom

    o3 = jnp.einsum('bmt,btd->bmd', p.astype(dt), v3,
                    preferred_element_type=jnp.float32)        # (Bb, H*S, D) f32

    # Output projection fused with head merge; bias folded into head 0.
    # TODO(synk): on v5e/v6e with H*D >= 128 a single (M,H*D)@(H*D,C_out)
    #             matmul would fill the MXU better than this per-head loop.
    def head_out(h):
        return o3[:, h * S:(h + 1) * S, :].reshape(M, D).astype(dt)

    out = jnp.dot(head_out(0), wo_ref[0],
                  preferred_element_type=jnp.float32) + bo_ref[...]
    for h in range(1, H):
        out = out + jnp.dot(head_out(h), wo_ref[h],
                            preferred_element_type=jnp.float32)
    o_ref[...] = out.astype(o_ref.dtype)


def _mqa_flash_kernel(xq_ref, xkv_ref, wq_ref, bq_ref, wk_ref, bk_ref,
                      wv_ref, bv_ref, wo_ref, bo_ref, o_ref,
                      q_scr, m_scr, l_scr, acc_scr, *,
                      seq_len, num_heads, head_dim, approx_recip):
    """Flash-style K/V streaming: grid = (batch, kv_tiles).

    xq_ref : (S, C_in)   full query rows of one batch element (resident)
    xkv_ref: (Tk, C_in)  rows of the current K/V tile
    Scratch: q_scr (H*S, D) dt, m/l (H*S, 1) f32, acc (H*S, D) f32.
    """
    S, H, D = seq_len, num_heads, head_dim
    dt = xq_ref.dtype
    kidx = pl.program_id(1)

    @pl.when(kidx == 0)
    def _():
        xq = xq_ref[...]
        q2 = jnp.dot(xq, wq_ref[...],
                     preferred_element_type=jnp.float32) + bq_ref[...]   # (S, H*D)
        q_scr[...] = jnp.concatenate(
            [q2[:, h * D:(h + 1) * D] for h in range(H)], axis=0).astype(dt)
        m_scr[...] = jnp.full_like(m_scr, -jnp.inf)
        l_scr[...] = jnp.zeros_like(l_scr)
        acc_scr[...] = jnp.zeros_like(acc_scr)

    xkv = xkv_ref[...]
    k_t = (jnp.dot(xkv, wk_ref[...],
                   preferred_element_type=jnp.float32) + bk_ref[...]).astype(dt)
    v_t = (jnp.dot(xkv, wv_ref[...],
                   preferred_element_type=jnp.float32) + bv_ref[...]).astype(dt)

    # Scale already folded into wq/bq.
    s = jnp.einsum('md,td->mt', q_scr[...], k_t,
                   preferred_element_type=jnp.float32)           # (H*S, Tk)
    m_new = jnp.maximum(m_scr[...], jnp.max(s, axis=-1, keepdims=True))
    alpha = jnp.exp(m_scr[...] - m_new)
    p = jnp.exp(s - m_new)
    l_scr[...] = alpha * l_scr[...] + jnp.sum(p, axis=-1, keepdims=True)
    acc_scr[...] = alpha * acc_scr[...] + jnp.dot(
        p.astype(dt), v_t, preferred_element_type=jnp.float32)
    m_scr[...] = m_new

    @pl.when(kidx == pl.num_programs(1) - 1)
    def _():
        if approx_recip:
            inv_l = pl.reciprocal(l_scr[...], approx=True)
        else:
            inv_l = 1.0 / l_scr[...]
        o_n = acc_scr[...] * inv_l                               # (H*S, D) f32
        out = jnp.dot(o_n[0:S, :].astype(dt), wo_ref[0],
                      preferred_element_type=jnp.float32) + bo_ref[...]
        for h in range(1, H):
            out = out + jnp.dot(o_n[h * S:(h + 1) * S, :].astype(dt), wo_ref[h],
                                preferred_element_type=jnp.float32)
        o_ref[...] = out.astype(o_ref.dtype)


# ---------------------------------------------------------------------------
# Spec helpers / hardware query
# ---------------------------------------------------------------------------
def _plain_weight_spec(a):
    return pl.BlockSpec(a.shape, lambda *_: (0,) * a.ndim)


def _weight_spec(a):
    # Constant-index weight/bias blocks: double buffering buys nothing, so ask
    # for single buffering (halves their VMEM footprint).
    try:
        return pl.BlockSpec(a.shape, lambda *_: (0,) * a.ndim,
                            pipeline_mode=pl.Buffered(1))
    except Exception:
        return _plain_weight_spec(a)


def _tpu_generation_info():
    """Best-effort (vmem_capacity_bytes, is_multi_tensorcore_chip)."""
    cap = None
    try:
        cap = int(getattr(pltpu.get_tpu_info(), "vmem_capacity_bytes", 0)) or None
    except Exception:
        cap = None
    kind = ""
    try:
        kind = str(getattr(jax.devices()[0], "device_kind", "")).lower()
    except Exception:
        pass
    if cap is None:
        cap = 64 * 1024 * 1024 if "v7" in kind else 128 * 1024 * 1024
    multi_tc = ("v7" in kind) or cap <= 64 * 1024 * 1024
    return cap, multi_tc


# ---------------------------------------------------------------------------
# Wrapper
# ---------------------------------------------------------------------------
def baseline_self_attention(x, params, *, num_heads, hidden_channels,
                            batch_block=None, kv_block=None,
                            force_flash=False, approx_reciprocal=True):
    """x: (B, S, C_in). params dict holds PyTorch-convention weights."""
    B, S, C_in = x.shape
    H, D = num_heads, hidden_channels
    C_out = params["w_out"].shape[0]
    dt = x.dtype
    itm = jnp.dtype(dt).itemsize
    scale = 1.0 / math.sqrt(D)

    # --- glue: PyTorch-convention params -> kernel layout -------------------
    # q_linear feature order '(hidden_channels num_heads)' is f = hc*H + head;
    # permute to head-major (g = head*D + hc) so the kernel can take
    # contiguous per-head slices.  1/sqrt(D) folded into wq/bq.
    perm = jnp.arange(H * D).reshape(H, D)
    perm = ((perm % D) * H + (perm // D)).reshape(-1)
    wq = (params["w_q"].T[:, perm] * scale).astype(dt)            # (C_in, H*D)
    bq = (params["b_q"][perm] * scale)[None, :].astype(jnp.float32)
    wk = params["w_k"].T.astype(dt)                               # (C_in, D)
    bk = params["b_k"][None, :].astype(jnp.float32)
    wv = params["w_v"].T.astype(dt)                               # (C_in, D)
    bv = params["b_v"][None, :].astype(jnp.float32)
    # out_linear input order '(num_heads hidden_channels)' is head-major.
    wo = params["w_out"].T.reshape(H, D, C_out).astype(dt)        # (H, D, C_out)
    bo = params["b_out"][None, :].astype(jnp.float32)             # (1, C_out)

    weight_args = (wq, bq, wk, bk, wv, bv, wo, bo)
    weight_bytes = sum(int(a.size) * jnp.dtype(a.dtype).itemsize
                       for a in weight_args)

    # --- generation-aware VMEM budget / limit -------------------------------
    cap, multi_tc = _tpu_generation_info()
    if cap <= 64 * 1024 * 1024:          # v7x-class: 64 MiB VMEM per TC
        budget, vmem_limit = 24 << 20, 48 << 20
    else:                                # v5e / v6e: 128 MiB VMEM
        budget, vmem_limit = 72 << 20, 96 << 20

    def est_single(bb):
        m = bb * S
        io = 2 * (m * C_in + m * C_out) * itm                 # double-buffered tiles
        proj = m * (H * D + 2 * D) * (4 + itm)                # q2/k2/v2 f32 + dt copies
        qfold = m * H * D * itm                               # q3 relayout copy
        scores = bb * H * S * S * (3 * 4 + itm)               # s, e, p + dt copy of p
        pv = m * H * D * 4 + m * C_out * 4                    # o3 + out accumulator
        return io + 2 * weight_bytes + proj + qfold + scores + pv

    def est_flash(tk):
        io = 2 * (S * C_in + tk * C_in + S * C_out) * itm
        scratch = H * S * (D * itm + D * 4 + 2 * 128 * 4)     # q, acc, m, l (lane-padded)
        kv = 2 * tk * D * (4 + itm)
        scores = H * S * tk * (3 * 4 + itm)
        return io + 2 * weight_bytes + scratch + kv + scores + S * C_out * 4

    # --- path / tile selection ----------------------------------------------
    use_flash = bool(force_flash)
    Bb = None
    if batch_block is not None:
        assert B % batch_block == 0
        assert batch_block == B or (batch_block * S) % 8 == 0
        Bb = batch_block
        use_flash = False
    elif not use_flash:
        divisors = [d for d in range(1, B + 1)
                    if B % d == 0 and (d == B or (d * S) % 8 == 0)]
        fits = [d for d in divisors if est_single(d) <= budget]
        if fits:
            if multi_tc:                 # keep >=2 parallel grid steps for 2 TCs
                fits = [d for d in fits if B // d >= 2] or fits
            Bb = max(fits)
        else:
            use_flash = True             # stream K/V instead of over-allocating

    x2 = x.reshape(B * S, C_in)          # free metadata reshape outside kernel

    def _call(build):
        try:
            return build([_weight_spec(a) for a in weight_args])
        except Exception:
            # Buffered(1) specs unsupported on this jax/TPU -> default buffering.
            return build([_plain_weight_spec(a) for a in weight_args])

    if not use_flash:
        kernel = partial(_mqa_single_pass_kernel, seq_len=S, num_heads=H,
                         head_dim=D, approx_recip=approx_reciprocal)

        def build(w_specs):
            return pl.pallas_call(
                kernel,
                out_shape=jax.ShapeDtypeStruct((B * S, C_out), dt),
                grid_spec=pltpu.PrefetchScalarGridSpec(
                    num_scalar_prefetch=0,
                    grid=(B // Bb,),
                    in_specs=[pl.BlockSpec((Bb * S, C_in), lambda i: (i, 0))]
                             + w_specs,
                    out_specs=pl.BlockSpec((Bb * S, C_out), lambda i: (i, 0)),
                ),
                compiler_params=pltpu.CompilerParams(
                    dimension_semantics=("parallel",),
                    vmem_limit_bytes=vmem_limit,
                ),
            )(x2, *weight_args)

        out = _call(build)
        return out.reshape(B, S, C_out)

    # --- flash (K/V-streamed) path ------------------------------------------
    if B > 1 and S % 8 != 0:
        raise ValueError("flash path requires S % 8 == 0 when B > 1")
    if kv_block is not None:
        assert S % kv_block == 0 and (kv_block % 8 == 0 or kv_block == S)
        Tk = kv_block
    else:
        cands = [t for t in (2048, 1024, 512, 256, 128, 64, 32, 16, 8)
                 if t <= S and S % t == 0]
        if not cands:
            raise ValueError(f"cannot pick a K/V tile for S={S}")
        tfits = [t for t in cands if est_flash(t) <= budget]
        Tk = max(tfits) if tfits else min(cands)
    n_kv = S // Tk

    kernel = partial(_mqa_flash_kernel, seq_len=S, num_heads=H, head_dim=D,
                     approx_recip=approx_reciprocal)

    def build(w_specs):
        return pl.pallas_call(
            kernel,
            out_shape=jax.ShapeDtypeStruct((B * S, C_out), dt),
            grid_spec=pltpu.PrefetchScalarGridSpec(
                num_scalar_prefetch=0,
                grid=(B, n_kv),
                in_specs=[pl.BlockSpec((S, C_in), lambda i, k: (i, 0)),
                          pl.BlockSpec((Tk, C_in),
                                       lambda i, k: (i * n_kv + k, 0))]
                         + w_specs,
                out_specs=pl.BlockSpec((S, C_out), lambda i, k: (i, 0)),
                scratch_shapes=[
                    pltpu.VMEM((H * S, D), dt),          # q (head-folded rows)
                    pltpu.VMEM((H * S, 1), jnp.float32),  # running max m
                    pltpu.VMEM((H * S, 1), jnp.float32),  # running sum l
                    pltpu.VMEM((H * S, D), jnp.float32),  # acc
                ],
            ),
            compiler_params=pltpu.CompilerParams(
                dimension_semantics=("parallel", "arbitrary"),
                vmem_limit_bytes=vmem_limit,
            ),
        )(x2, x2, *weight_args)

    out = _call(build)
    return out.reshape(B, S, C_out)


# ---------------------------------------------------------------------------
# Pure-JAX reference mirroring the PyTorch module semantics
# ---------------------------------------------------------------------------
def _reference(x, params, *, num_heads, hidden_channels):
    H, D = num_heads, hidden_channels
    B, S, _ = x.shape
    q = x @ params["w_q"].T + params["b_q"]                      # (B,S,H*D) hc-major
    k = x @ params["w_k"].T + params["b_k"]                      # (B,S,D)
    v = x @ params["w_v"].T + params["b_v"]                      # (B,S,D)
    q = q.reshape(B, S, D, H).transpose(0, 3, 1, 2)              # (B,H,S,D)
    scale = 1.0 / math.sqrt(D)
    scores = jnp.einsum("bhsd,btd->bhst", q, k) * scale
    p = jax.nn.softmax(scores, axis=-1)
    o = jnp.einsum("bhst,btd->bhsd", p, v)                       # (B,H,S,D)
    h = o.transpose(0, 2, 1, 3).reshape(B, S, H * D)             # head-major merge
    return h @ params["w_out"].T + params["b_out"]


if __name__ == "__main__":
    def init_linear(kw, kb, fan_in, fan_out):
        bound = 1.0 / math.sqrt(fan_in)
        w = jax.random.uniform(kw, (fan_out, fan_in), jnp.float32, -bound, bound)
        b = jax.random.uniform(kb, (fan_out,), jnp.float32, -bound, bound)
        return w, b

    def make_case(key, B, S, C_in, D, H, C_out):
        keys = jax.random.split(key, 9)
        w_q, b_q = init_linear(keys[0], keys[1], C_in, D * H)
        w_k, b_k = init_linear(keys[2], keys[3], C_in, D)
        w_v, b_v = init_linear(keys[4], keys[5], C_in, D)
        w_out, b_out = init_linear(keys[6], keys[7], D * H, C_out)
        params = dict(w_q=w_q, b_q=b_q, w_k=w_k, b_k=b_k, w_v=w_v, b_v=b_v,
                      w_out=w_out, b_out=b_out)
        x = jax.random.normal(keys[8], (B, S, C_in), jnp.float32)
        return x, params

    key = jax.random.PRNGKey(0)
    k1, k2 = jax.random.split(key)

    # Case 1: tiny shapes -> single-pass path.
    B, S, C_in, D, H, C_out = 2, 8, 16, 8, 4, 16
    x, params = make_case(k1, B, S, C_in, D, H, C_out)
    out = jax.block_until_ready(
        baseline_self_attention(x, params, num_heads=H, hidden_channels=D))
    ref = _reference(x, params, num_heads=H, hidden_channels=D)
    assert out.shape == (B, S, C_out)
    # tolerance reflects the approx (EUP) reciprocal in the softmax; a real
    # bug (wrong head mapping / permutation) would be O(1).
    assert jnp.allclose(out, ref, atol=5e-3, rtol=5e-3), \
        f"single-pass max err {jnp.max(jnp.abs(out - ref))}"

    # Case 2: longer sequence -> forced flash (K/V-streamed) path.
    B, S, C_in, D, H, C_out = 2, 256, 64, 32, 4, 64
    x, params = make_case(k2, B, S, C_in, D, H, C_out)
    out = jax.block_until_ready(
        baseline_self_attention(x, params, num_heads=H, hidden_channels=D,
                                force_flash=True, kv_block=128))
    ref = _reference(x, params, num_heads=H, hidden_channels=D)
    assert out.shape == (B, S, C_out)
    assert jnp.allclose(out, ref, atol=5e-3, rtol=5e-3), \
        f"flash max err {jnp.max(jnp.abs(out - ref))}"

    print("KERNEL_OK")
</pallas_src>

<mosaic_0001>
module attributes {stable_mosaic.version = 11 : i64} {
  func.func @_mqa_single_pass_kernel(%arg0: i32, %arg1: memref<16x16xf32, #tpu.memory_space<vmem>>, %arg2: memref<16x32xf32, #tpu.memory_space<vmem>>, %arg3: memref<1x32xf32, #tpu.memory_space<vmem>>, %arg4: memref<16x8xf32, #tpu.memory_space<vmem>>, %arg5: memref<1x8xf32, #tpu.memory_space<vmem>>, %arg6: memref<16x8xf32, #tpu.memory_space<vmem>>, %arg7: memref<1x8xf32, #tpu.memory_space<vmem>>, %arg8: memref<4x8x16xf32, #tpu.memory_space<vmem>>, %arg9: memref<1x16xf32, #tpu.memory_space<vmem>>, %arg10: memref<16x16xf32, #tpu.memory_space<vmem>>) attributes {dimension_semantics = [#tpu.dimension_semantics<parallel>], iteration_bounds = array<i64: 1>, scalar_prefetch = 0 : i64, scratch_operands = 0 : i64, tpu.core_type = #tpu.core_type<tc>, window_params = [{transform_indices = @transform_0, window_bounds = array<i64: 16, 16>}, {pipeline_mode = #tpu.pipeline_mode<synchronous>, transform_indices = @transform_1, window_bounds = array<i64: 16, 32>}, {pipeline_mode = #tpu.pipeline_mode<synchronous>, transform_indices = @transform_2, window_bounds = array<i64: 1, 32>}, {pipeline_mode = #tpu.pipeline_mode<synchronous>, transform_indices = @transform_3, window_bounds = array<i64: 16, 8>}, {pipeline_mode = #tpu.pipeline_mode<synchronous>, transform_indices = @transform_4, window_bounds = array<i64: 1, 8>}, {pipeline_mode = #tpu.pipeline_mode<synchronous>, transform_indices = @transform_5, window_bounds = array<i64: 16, 8>}, {pipeline_mode = #tpu.pipeline_mode<synchronous>, transform_indices = @transform_6, window_bounds = array<i64: 1, 8>}, {pipeline_mode = #tpu.pipeline_mode<synchronous>, transform_indices = @transform_7, window_bounds = array<i64: 4, 8, 16>}, {pipeline_mode = #tpu.pipeline_mode<synchronous>, transform_indices = @transform_8, window_bounds = array<i64: 1, 16>}, {transform_indices = @transform_9, window_bounds = array<i64: 16, 16>}]} {
    %c0 = arith.constant 0 : index
    %c0_0 = arith.constant 0 : index
    %0 = vector.load %arg1[%c0, %c0_0] : memref<16x16xf32, #tpu.memory_space<vmem>>, vector<16x16xf32>
    %c0_1 = arith.constant 0 : index
    %c0_2 = arith.constant 0 : index
    %1 = vector.load %arg2[%c0_1, %c0_2] : memref<16x32xf32, #tpu.memory_space<vmem>>, vector<16x32xf32>
    %cst = arith.constant dense<0.000000e+00> : vector<16x32xf32>
    %2 = tpu.matmul %0, %1, %cst {dimension_numbers = #tpu.dot_dimension_numbers<[1], [0], [0], [1], [0, 0, 1, 1], [], []>} : vector<16x16xf32>, vector<16x32xf32>, vector<16x32xf32> -> vector<16x32xf32>
    %c0_3 = arith.constant 0 : index
    %c0_4 = arith.constant 0 : index
    %3 = vector.load %arg3[%c0_3, %c0_4] : memref<1x32xf32, #tpu.memory_space<vmem>>, vector<1x32xf32>
    %4 = vector.broadcast %3 : vector<1x32xf32> to vector<16x32xf32>
    %5 = arith.addf %2, %4 : vector<16x32xf32>
    %c0_5 = arith.constant 0 : index
    %c0_6 = arith.constant 0 : index
    %6 = vector.load %arg4[%c0_5, %c0_6] : memref<16x8xf32, #tpu.memory_space<vmem>>, vector<16x8xf32>
    %cst_7 = arith.constant dense<0.000000e+00> : vector<16x8xf32>
    %7 = tpu.matmul %0, %6, %cst_7 {dimension_numbers = #tpu.dot_dimension_numbers<[1], [0], [0], [1], [0, 0, 1, 1], [], []>} : vector<16x16xf32>, vector<16x8xf32>, vector<16x8xf32> -> vector<16x8xf32>
    %c0_8 = arith.constant 0 : index
    %c0_9 = arith.constant 0 : index
    %8 = vector.load %arg5[%c0_8, %c0_9] : memref<1x8xf32, #tpu.memory_space<vmem>>, vector<1x8xf32>
    %9 = vector.broadcast %8 : vector<1x8xf32> to vector<16x8xf32>
    %10 = arith.addf %7, %9 : vector<16x8xf32>
    %c0_10 = arith.constant 0 : index
    %c0_11 = arith.constant 0 : index
    %11 = vector.load %arg6[%c0_10, %c0_11] : memref<16x8xf32, #tpu.memory_space<vmem>>, vector<16x8xf32>
    %cst_12 = arith.constant dense<0.000000e+00> : vector<16x8xf32>
    %12 = tpu.matmul %0, %11, %cst_12 {dimension_numbers = #tpu.dot_dimension_numbers<[1], [0], [0], [1], [0, 0, 1, 1], [], []>} : vector<16x16xf32>, vector<16x8xf32>, vector<16x8xf32> -> vector<16x8xf32>
    %c0_13 = arith.constant 0 : index
    %c0_14 = arith.constant 0 : index
    %13 = vector.load %arg7[%c0_13, %c0_14] : memref<1x8xf32, #tpu.memory_space<vmem>>, vector<1x8xf32>
    %14 = vector.broadcast %13 : vector<1x8xf32> to vector<16x8xf32>
    %15 = arith.addf %12, %14 : vector<16x8xf32>
    %16 = vector.shape_cast %10 : vector<16x8xf32> to vector<2x8x8xf32>
    %17 = vector.shape_cast %15 : vector<16x8xf32> to vector<2x8x8xf32>
    %18 = vector.extract_strided_slice %5 {offsets = [0, 0], sizes = [16, 8], strides = [1, 1]} : vector<16x32xf32> to vector<16x8xf32>
    %19 = vector.shape_cast %18 : vector<16x8xf32> to vector<2x8x8xf32>
    %20 = vector.extract_strided_slice %5 {offsets = [0, 8], sizes = [16, 8], strides = [1, 1]} : vector<16x32xf32> to vector<16x8xf32>
    %21 = vector.shape_cast %20 : vector<16x8xf32> to vector<2x8x8xf32>
    %22 = vector.extract_strided_slice %5 {offsets = [0, 16], sizes = [16, 8], strides = [1, 1]} : vector<16x32xf32> to vector<16x8xf32>
    %23 = vector.shape_cast %22 : vector<16x8xf32> to vector<2x8x8xf32>
    %24 = vector.extract_strided_slice %5 {offsets = [0, 24], sizes = [16, 8], strides = [1, 1]} : vector<16x32xf32> to vector<16x8xf32>
    %25 = vector.shape_cast %24 : vector<16x8xf32> to vector<2x8x8xf32>
    %26 = tpu.concatenate %19, %21, %23, %25 in 1 : vector<2x8x8xf32>, vector<2x8x8xf32>, vector<2x8x8xf32>, vector<2x8x8xf32> -> vector<2x32x8xf32>
    "tpu.trace_start"() <{level = 10 : i32, message = "bmd,btd->bmt"}> : () -> ()
    %cst_15 = arith.constant dense<0.000000e+00> : vector<2x32x8xf32>
    %27 = tpu.matmul %26, %16, %cst_15 {dimension_numbers = #tpu.dot_dimension_numbers<[2], [2], [1], [1], [0, 0, 0, 1, 1, 1], [0], [0]>} : vector<2x32x8xf32>, vector<2x8x8xf32>, vector<2x32x8xf32> -> vector<2x32x8xf32>
    "tpu.trace_stop"() : () -> ()
    %cst_16 = arith.constant dense<0xFF800000> : vector<2x32xf32>
    %28 = vector.multi_reduction <maximumf>, %27, %cst_16 [2] : vector<2x32x8xf32> to vector<2x32xf32>
    %29 = vector.shape_cast %28 : vector<2x32xf32> to vector<2x32x1xf32>
    %30 = vector.broadcast %29 : vector<2x32x1xf32> to vector<2x32x8xf32>
    %31 = arith.subf %27, %30 : vector<2x32x8xf32>
    %32 = math.exp %31 : vector<2x32x8xf32>
    %cst_17 = arith.constant dense<0.000000e+00> : vector<2x32xf32>
    %33 = vector.multi_reduction <add>, %32, %cst_17 [2] : vector<2x32x8xf32> to vector<2x32xf32>
    %34 = vector.shape_cast %33 : vector<2x32xf32> to vector<2x32x1xf32>
    %35 = tpu.reciprocal %34 {approx = true} : vector<2x32x1xf32> -> vector<2x32x1xf32>
    %36 = vector.broadcast %35 : vector<2x32x1xf32> to vector<2x32x8xf32>
    %37 = arith.mulf %32, %36 : vector<2x32x8xf32>
    "tpu.trace_start"() <{level = 10 : i32, message = "bmt,btd->bmd"}> : () -> ()
    %cst_18 = arith.constant dense<0.000000e+00> : vector<2x32x8xf32>
    %38 = tpu.matmul %37, %17, %cst_18 {dimension_numbers = #tpu.dot_dimension_numbers<[2], [1], [1], [2], [0, 0, 0, 1, 1, 2], [0], [0]>} : vector<2x32x8xf32>, vector<2x8x8xf32>, vector<2x32x8xf32> -> vector<2x32x8xf32>
    "tpu.trace_stop"() : () -> ()
    %39 = vector.extract_strided_slice %38 {offsets = [0, 0, 0], sizes = [2, 8, 8], strides = [1, 1, 1]} : vector<2x32x8xf32> to vector<2x8x8xf32>
    %40 = vector.shape_cast %39 : vector<2x8x8xf32> to vector<16x8xf32>
    %c0_19 = arith.constant 0 : index
    %c0_20 = arith.constant 0 : index
    %c0_21 = arith.constant 0 : index
    %41 = vector.load %arg8[%c0_19, %c0_20, %c0_21] : memref<4x8x16xf32, #tpu.memory_space<vmem>>, vector<1x8x16xf32>
    %42 = vector.shape_cast %41 : vector<1x8x16xf32> to vector<8x16xf32>
    %cst_22 = arith.constant dense<0.000000e+00> : vector<16x16xf32>
    %43 = tpu.matmul %40, %42, %cst_22 {dimension_numbers = #tpu.dot_dimension_numbers<[1], [0], [0], [1], [0, 0, 1, 1], [], []>} : vector<16x8xf32>, vector<8x16xf32>, vector<16x16xf32> -> vector<16x16xf32>
    %c0_23 = arith.constant 0 : index
    %c0_24 = arith.constant 0 : index
    %44 = vector.load %arg9[%c0_23, %c0_24] : memref<1x16xf32, #tpu.memory_space<vmem>>, vector<1x16xf32>
    %45 = vector.broadcast %44 : vector<1x16xf32> to vector<16x16xf32>
    %46 = arith.addf %43, %45 : vector<16x16xf32>
    %47 = vector.extract_strided_slice %38 {offsets = [0, 8, 0], sizes = [2, 8, 8], strides = [1, 1, 1]} : vector<2x32x8xf32> to vector<2x8x8xf32>
    %48 = vector.shape_cast %47 : vector<2x8x8xf32> to vector<16x8xf32>
    %c1 = arith.constant 1 : index
    %c0_25 = arith.constant 0 : index
    %c0_26 = arith.constant 0 : index
    %49 = vector.load %arg8[%c1, %c0_25, %c0_26] : memref<4x8x16xf32, #tpu.memory_space<vmem>>, vector<1x8x16xf32>
    %50 = vector.shape_cast %49 : vector<1x8x16xf32> to vector<8x16xf32>
    %cst_27 = arith.constant dense<0.000000e+00> : vector<16x16xf32>
    %51 = tpu.matmul %48, %50, %cst_27 {dimension_numbers = #tpu.dot_dimension_numbers<[1], [0], [0], [1], [0, 0, 1, 1], [], []>} : vector<16x8xf32>, vector<8x16xf32>, vector<16x16xf32> -> vector<16x16xf32>
    %52 = arith.addf %46, %51 : vector<16x16xf32>
    %53 = vector.extract_strided_slice %38 {offsets = [0, 16, 0], sizes = [2, 8, 8], strides = [1, 1, 1]} : vector<2x32x8xf32> to vector<2x8x8xf32>
    %54 = vector.shape_cast %53 : vector<2x8x8xf32> to vector<16x8xf32>
    %c2 = arith.constant 2 : index
    %c0_28 = arith.constant 0 : index
    %c0_29 = arith.constant 0 : index
    %55 = vector.load %arg8[%c2, %c0_28, %c0_29] : memref<4x8x16xf32, #tpu.memory_space<vmem>>, vector<1x8x16xf32>
    %56 = vector.shape_cast %55 : vector<1x8x16xf32> to vector<8x16xf32>
    %cst_30 = arith.constant dense<0.000000e+00> : vector<16x16xf32>
    %57 = tpu.matmul %54, %56, %cst_30 {dimension_numbers = #tpu.dot_dimension_numbers<[1], [0], [0], [1], [0, 0, 1, 1], [], []>} : vector<16x8xf32>, vector<8x16xf32>, vector<16x16xf32> -> vector<16x16xf32>
    %58 = arith.addf %52, %57 : vector<16x16xf32>
    %59 = vector.extract_strided_slice %38 {offsets = [0, 24, 0], sizes = [2, 8, 8], strides = [1, 1, 1]} : vector<2x32x8xf32> to vector<2x8x8xf32>
    %60 = vector.shape_cast %59 : vector<2x8x8xf32> to vector<16x8xf32>
    %c3 = arith.constant 3 : index
    %c0_31 = arith.constant 0 : index
    %c0_32 = arith.constant 0 : index
    %61 = vector.load %arg8[%c3, %c0_31, %c0_32] : memref<4x8x16xf32, #tpu.memory_space<vmem>>, vector<1x8x16xf32>
    %62 = vector.shape_cast %61 : vector<1x8x16xf32> to vector<8x16xf32>
    %cst_33 = arith.constant dense<0.000000e+00> : vector<16x16xf32>
    %63 = tpu.matmul %60, %62, %cst_33 {dimension_numbers = #tpu.dot_dimension_numbers<[1], [0], [0], [1], [0, 0, 1, 1], [], []>} : vector<16x8xf32>, vector<8x16xf32>, vector<16x16xf32> -> vector<16x16xf32>
    %64 = arith.addf %58, %63 : vector<16x16xf32>
    %c0_34 = arith.constant 0 : index
    %c0_35 = arith.constant 0 : index
    %65 = vector.load %arg10[%c0_34, %c0_35] : memref<16x16xf32, #tpu.memory_space<vmem>>, vector<16x16xf32>
    tpu.vector_store %arg10[%c0_34, %c0_35], %64 {strides = array<i32>} : memref<16x16xf32, #tpu.memory_space<vmem>>, vector<16x16xf32>,
    return
  }
  func.func @transform_0(%arg0: i32) -> (i32, i32) {
    %c0_i32 = arith.constant 0 : i32
    %c0_i32_0 = arith.constant 0 : i32
    return %arg0, %c0_i32 : i32, i32
  }
  func.func @transform_1(%arg0: i32) -> (i32, i32) {
    %c0_i32 = arith.constant 0 : i32
    %c0_i32_0 = arith.constant 0 : i32
    %c0_i32_1 = arith.constant 0 : i32
    return %c0_i32, %c0_i32_0 : i32, i32
  }
  func.func @transform_2(%arg0: i32) -> (i32, i32) {
    %c0_i32 = arith.constant 0 : i32
    %c0_i32_0 = arith.constant 0 : i32
    %c0_i32_1 = arith.constant 0 : i32
    return %c0_i32, %c0_i32_0 : i32, i32
  }
  func.func @transform_3(%arg0: i32) -> (i32, i32) {
    %c0_i32 = arith.constant 0 : i32
    %c0_i32_0 = arith.constant 0 : i32
    %c0_i32_1 = arith.constant 0 : i32
    return %c0_i32, %c0_i32_0 : i32, i32
  }
  func.func @transform_4(%arg0: i32) -> (i32, i32) {
    %c0_i32 = arith.constant 0 : i32
    %c0_i32_0 = arith.constant 0 : i32
    %c0_i32_1 = arith.constant 0 : i32
    return %c0_i32, %c0_i32_0 : i32, i32
  }
  func.func @transform_5(%arg0: i32) -> (i32, i32) {
    %c0_i32 = arith.constant 0 : i32
    %c0_i32_0 = arith.constant 0 : i32
    %c0_i32_1 = arith.constant 0 : i32
    return %c0_i32, %c0_i32_0 : i32, i32
  }
  func.func @transform_6(%arg0: i32) -> (i32, i32) {
    %c0_i32 = arith.constant 0 : i32
    %c0_i32_0 = arith.constant 0 : i32
    %c0_i32_1 = arith.constant 0 : i32
    return %c0_i32, %c0_i32_0 : i32, i32
  }
  func.func @transform_7(%arg0: i32) -> (i32, i32, i32) {
    %c0_i32 = arith.constant 0 : i32
    %c0_i32_0 = arith.constant 0 : i32
    %c0_i32_1 = arith.constant 0 : i32
    %c0_i32_2 = arith.constant 0 : i32
    return %c0_i32, %c0_i32_0, %c0_i32_1 : i32, i32, i32
  }
  func.func @transform_8(%arg0: i32) -> (i32, i32) {
    %c0_i32 = arith.constant 0 : i32
    %c0_i32_0 = arith.constant 0 : i32
    %c0_i32_1 = arith.constant 0 : i32
    return %c0_i32, %c0_i32_0 : i32, i32
  }
  func.func @transform_9(%arg0: i32) -> (i32, i32) {
    %c0_i32 = arith.constant 0 : i32
    %c0_i32_0 = arith.constant 0 : i32
    return %arg0, %c0_i32 : i32, i32
  }
}

module attributes {stable_mosaic.version = 11 : i64} {
  func.func @_mqa_single_pass_kernel(%arg0: i32, %arg1: memref<16x16xf32, #tpu.memory_space<vmem>>, %arg2: memref<16x32xf32, #tpu.memory_space<vmem>>, %arg3: memref<1x32xf32, #tpu.memory_space<vmem>>, %arg4: memref<16x8xf32, #tpu.memory_space<vmem>>, %arg5: memref<1x8xf32, #tpu.memory_space<vmem>>, %arg6: memref<16x8xf32, #tpu.memory_space<vmem>>, %arg7: memref<1x8xf32, #tpu.memory_space<vmem>>, %arg8: memref<4x8x16xf32, #tpu.memory_space<vmem>>, %arg9: memref<1x16xf32, #tpu.memory_space<vmem>>, %arg10: memref<16x16xf32, #tpu.memory_space<vmem>>) attributes {dimension_semantics = [#tpu.dimension_semantics<parallel>], iteration_bounds = array<i64: 1>, scalar_prefetch = 0 : i64, scratch_operands = 0 : i64, tpu.core_type = #tpu.core_type<tc>, window_params = [{transform_indices = @transform_0, window_bounds = array<i64: 16, 16>}, {pipeline_mode = #tpu.pipeline_mode<synchronous>, transform_indices = @transform_1, window_bounds = array<i64: 16, 32>}, {pipeline_mode = #tpu.pipeline_mode<synchronous>, transform_indices = @transform_2, window_bounds = array<i64: 1, 32>}, {pipeline_mode = #tpu.pipeline_mode<synchronous>, transform_indices = @transform_3, window_bounds = array<i64: 16, 8>}, {pipeline_mode = #tpu.pipeline_mode<synchronous>, transform_indices = @transform_4, window_bounds = array<i64: 1, 8>}, {pipeline_mode = #tpu.pipeline_mode<synchronous>, transform_indices = @transform_5, window_bounds = array<i64: 16, 8>}, {pipeline_mode = #tpu.pipeline_mode<synchronous>, transform_indices = @transform_6, window_bounds = array<i64: 1, 8>}, {pipeline_mode = #tpu.pipeline_mode<synchronous>, transform_indices = @transform_7, window_bounds = array<i64: 4, 8, 16>}, {pipeline_mode = #tpu.pipeline_mode<synchronous>, transform_indices = @transform_8, window_bounds = array<i64: 1, 16>}, {transform_indices = @transform_9, window_bounds = array<i64: 16, 16>}]} {
    %c0 = arith.constant 0 : index
    %c0_0 = arith.constant 0 : index
    %0 = vector.load %arg1[%c0, %c0_0] : memref<16x16xf32, #tpu.memory_space<vmem>>, vector<16x16xf32>
    %c0_1 = arith.constant 0 : index
    %c0_2 = arith.constant 0 : index
    %1 = vector.load %arg2[%c0_1, %c0_2] : memref<16x32xf32, #tpu.memory_space<vmem>>, vector<16x32xf32>
    %cst = arith.constant dense<0.000000e+00> : vector<16x32xf32>
    %2 = tpu.matmul %0, %1, %cst {dimension_numbers = #tpu.dot_dimension_numbers<[1], [0], [0], [1], [0, 0, 1, 1], [], []>} : vector<16x16xf32>, vector<16x32xf32>, vector<16x32xf32> -> vector<16x32xf32>
    %c0_3 = arith.constant 0 : index
    %c0_4 = arith.constant 0 : index
    %3 = vector.load %arg3[%c0_3, %c0_4] : memref<1x32xf32, #tpu.memory_space<vmem>>, vector<1x32xf32>
    %4 = vector.broadcast %3 : vector<1x32xf32> to vector<16x32xf32>
    %5 = arith.addf %2, %4 : vector<16x32xf32>
    %c0_5 = arith.constant 0 : index
    %c0_6 = arith.constant 0 : index
    %6 = vector.load %arg4[%c0_5, %c0_6] : memref<16x8xf32, #tpu.memory_space<vmem>>, vector<16x8xf32>
    %cst_7 = arith.constant dense<0.000000e+00> : vector<16x8xf32>
    %7 = tpu.matmul %0, %6, %cst_7 {dimension_numbers = #tpu.dot_dimension_numbers<[1], [0], [0], [1], [0, 0, 1, 1], [], []>} : vector<16x16xf32>, vector<16x8xf32>, vector<16x8xf32> -> vector<16x8xf32>
    %c0_8 = arith.constant 0 : index
    %c0_9 = arith.constant 0 : index
    %8 = vector.load %arg5[%c0_8, %c0_9] : memref<1x8xf32, #tpu.memory_space<vmem>>, vector<1x8xf32>
    %9 = vector.broadcast %8 : vector<1x8xf32> to vector<16x8xf32>
    %10 = arith.addf %7, %9 : vector<16x8xf32>
    %c0_10 = arith.constant 0 : index
    %c0_11 = arith.constant 0 : index
    %11 = vector.load %arg6[%c0_10, %c0_11] : memref<16x8xf32, #tpu.memory_space<vmem>>, vector<16x8xf32>
    %cst_12 = arith.constant dense<0.000000e+00> : vector<16x8xf32>
    %12 = tpu.matmul %0, %11, %cst_12 {dimension_numbers = #tpu.dot_dimension_numbers<[1], [0], [0], [1], [0, 0, 1, 1], [], []>} : vector<16x16xf32>, vector<16x8xf32>, vector<16x8xf32> -> vector<16x8xf32>
    %c0_13 = arith.constant 0 : index
    %c0_14 = arith.constant 0 : index
    %13 = vector.load %arg7[%c0_13, %c0_14] : memref<1x8xf32, #tpu.memory_space<vmem>>, vector<1x8xf32>
    %14 = vector.broadcast %13 : vector<1x8xf32> to vector<16x8xf32>
    %15 = arith.addf %12, %14 : vector<16x8xf32>
    %16 = vector.shape_cast %10 : vector<16x8xf32> to vector<2x8x8xf32>
    %17 = vector.shape_cast %15 : vector<16x8xf32> to vector<2x8x8xf32>
    %18 = vector.extract_strided_slice %5 {offsets = [0, 0], sizes = [16, 8], strides = [1, 1]} : vector<16x32xf32> to vector<16x8xf32>
    %19 = vector.shape_cast %18 : vector<16x8xf32> to vector<2x8x8xf32>
    %20 = vector.extract_strided_slice %5 {offsets = [0, 8], sizes = [16, 8], strides = [1, 1]} : vector<16x32xf32> to vector<16x8xf32>
    %21 = vector.shape_cast %20 : vector<16x8xf32> to vector<2x8x8xf32>
    %22 = vector.extract_strided_slice %5 {offsets = [0, 16], sizes = [16, 8], strides = [1, 1]} : vector<16x32xf32> to vector<16x8xf32>
    %23 = vector.shape_cast %22 : vector<16x8xf32> to vector<2x8x8xf32>
    %24 = vector.extract_strided_slice %5 {offsets = [0, 24], sizes = [16, 8], strides = [1, 1]} : vector<16x32xf32> to vector<16x8xf32>
    %25 = vector.shape_cast %24 : vector<16x8xf32> to vector<2x8x8xf32>
    %26 = tpu.concatenate %19, %21, %23, %25 in 1 : vector<2x8x8xf32>, vector<2x8x8xf32>, vector<2x8x8xf32>, vector<2x8x8xf32> -> vector<2x32x8xf32>
    "tpu.trace_start"() <{level = 10 : i32, message = "bmd,btd->bmt"}> : () -> ()
    %cst_15 = arith.constant dense<0.000000e+00> : vector<2x32x8xf32>
    %27 = tpu.matmul %26, %16, %cst_15 {dimension_numbers = #tpu.dot_dimension_numbers<[2], [2], [1], [1], [0, 0, 0, 1, 1, 1], [0], [0]>} : vector<2x32x8xf32>, vector<2x8x8xf32>, vector<2x32x8xf32> -> vector<2x32x8xf32>
    "tpu.trace_stop"() : () -> ()
    %cst_16 = arith.constant dense<0xFF800000> : vector<2x32xf32>
    %28 = vector.multi_reduction <maximumf>, %27, %cst_16 [2] : vector<2x32x8xf32> to vector<2x32xf32>
    %29 = vector.shape_cast %28 : vector<2x32xf32> to vector<2x32x1xf32>
    %30 = vector.broadcast %29 : vector<2x32x1xf32> to vector<2x32x8xf32>
    %31 = arith.subf %27, %30 : vector<2x32x8xf32>
    %32 = math.exp %31 : vector<2x32x8xf32>
    %cst_17 = arith.constant dense<0.000000e+00> : vector<2x32xf32>
    %33 = vector.multi_reduction <add>, %32, %cst_17 [2] : vector<2x32x8xf32> to vector<2x32xf32>
    %34 = vector.shape_cast %33 : vector<2x32xf32> to vector<2x32x1xf32>
    %35 = tpu.reciprocal %34 {approx = true} : vector<2x32x1xf32> -> vector<2x32x1xf32>
    %36 = vector.broadcast %35 : vector<2x32x1xf32> to vector<2x32x8xf32>
    %37 = arith.mulf %32, %36 : vector<2x32x8xf32>
    "tpu.trace_start"() <{level = 10 : i32, message = "bmt,btd->bmd"}> : () -> ()
    %cst_18 = arith.constant dense<0.000000e+00> : vector<2x32x8xf32>
    %38 = tpu.matmul %37, %17, %cst_18 {dimension_numbers = #tpu.dot_dimension_numbers<[2], [1], [1], [2], [0, 0, 0, 1, 1, 2], [0], [0]>} : vector<2x32x8xf32>, vector<2x8x8xf32>, vector<2x32x8xf32> -> vector<2x32x8xf32>
    "tpu.trace_stop"() : () -> ()
    %39 = vector.extract_strided_slice %38 {offsets = [0, 0, 0], sizes = [2, 8, 8], strides = [1, 1, 1]} : vector<2x32x8xf32> to vector<2x8x8xf32>
    %40 = vector.shape_cast %39 : vector<2x8x8xf32> to vector<16x8xf32>
    %c0_19 = arith.constant 0 : index
    %c0_20 = arith.constant 0 : index
    %c0_21 = arith.constant 0 : index
    %41 = vector.load %arg8[%c0_19, %c0_20, %c0_21] : memref<4x8x16xf32, #tpu.memory_space<vmem>>, vector<1x8x16xf32>
    %42 = vector.shape_cast %41 : vector<1x8x16xf32> to vector<8x16xf32>
    %cst_22 = arith.constant dense<0.000000e+00> : vector<16x16xf32>
    %43 = tpu.matmul %40, %42, %cst_22 {dimension_numbers = #tpu.dot_dimension_numbers<[1], [0], [0], [1], [0, 0, 1, 1], [], []>} : vector<16x8xf32>, vector<8x16xf32>, vector<16x16xf32> -> vector<16x16xf32>
    %c0_23 = arith.constant 0 : index
    %c0_24 = arith.constant 0 : index
    %44 = vector.load %arg9[%c0_23, %c0_24] : memref<1x16xf32, #tpu.memory_space<vmem>>, vector<1x16xf32>
    %45 = vector.broadcast %44 : vector<1x16xf32> to vector<16x16xf32>
    %46 = arith.addf %43, %45 : vector<16x16xf32>
    %47 = vector.extract_strided_slice %38 {offsets = [0, 8, 0], sizes = [2, 8, 8], strides = [1, 1, 1]} : vector<2x32x8xf32> to vector<2x8x8xf32>
    %48 = vector.shape_cast %47 : vector<2x8x8xf32> to vector<16x8xf32>
    %c1 = arith.constant 1 : index
    %c0_25 = arith.constant 0 : index
    %c0_26 = arith.constant 0 : index
    %49 = vector.load %arg8[%c1, %c0_25, %c0_26] : memref<4x8x16xf32, #tpu.memory_space<vmem>>, vector<1x8x16xf32>
    %50 = vector.shape_cast %49 : vector<1x8x16xf32> to vector<8x16xf32>
    %cst_27 = arith.constant dense<0.000000e+00> : vector<16x16xf32>
    %51 = tpu.matmul %48, %50, %cst_27 {dimension_numbers = #tpu.dot_dimension_numbers<[1], [0], [0], [1], [0, 0, 1, 1], [], []>} : vector<16x8xf32>, vector<8x16xf32>, vector<16x16xf32> -> vector<16x16xf32>
    %52 = arith.addf %46, %51 : vector<16x16xf32>
    %53 = vector.extract_strided_slice %38 {offsets = [0, 16, 0], sizes = [2, 8, 8], strides = [1, 1, 1]} : vector<2x32x8xf32> to vector<2x8x8xf32>
    %54 = vector.shape_cast %53 : vector<2x8x8xf32> to vector<16x8xf32>
    %c2 = arith.constant 2 : index
    %c0_28 = arith.constant 0 : index
    %c0_29 = arith.constant 0 : index
    %55 = vector.load %arg8[%c2, %c0_28, %c0_29] : memref<4x8x16xf32, #tpu.memory_space<vmem>>, vector<1x8x16xf32>
    %56 = vector.shape_cast %55 : vector<1x8x16xf32> to vector<8x16xf32>
    %cst_30 = arith.constant dense<0.000000e+00> : vector<16x16xf32>
    %57 = tpu.matmul %54, %56, %cst_30 {dimension_numbers = #tpu.dot_dimension_numbers<[1], [0], [0], [1], [0, 0, 1, 1], [], []>} : vector<16x8xf32>, vector<8x16xf32>, vector<16x16xf32> -> vector<16x16xf32>
    %58 = arith.addf %52, %57 : vector<16x16xf32>
    %59 = vector.extract_strided_slice %38 {offsets = [0, 24, 0], sizes = [2, 8, 8], strides = [1, 1, 1]} : vector<2x32x8xf32> to vector<2x8x8xf32>
    %60 = vector.shape_cast %59 : vector<2x8x8xf32> to vector<16x8xf32>
    %c3 = arith.constant 3 : index
    %c0_31 = arith.constant 0 : index
    %c0_32 = arith.constant 0 : index
    %61 = vector.load %arg8[%c3, %c0_31, %c0_32] : memref<4x8x16xf32, #tpu.memory_space<vmem>>, vector<1x8x16xf32>
    %62 = vector.shape_cast %61 : vector<1x8x16xf32> to vector<8x16xf32>
    %cst_33 = arith.constant dense<0.000000e+00> : vector<16x16xf32>
    %63 = tpu.matmul %60, %62, %cst_33 {dimension_numbers = #tpu.dot_dimension_numbers<[1], [0], [0], [1], [0, 0, 1, 1], [], []>} : vector<16x8xf32>, vector<8x16xf32>, vector<16x16xf32> -> vector<16x16xf32>
    %64 = arith.addf %58, %63 : vector<16x16xf32>
    %c0_34 = arith.constant 0 : index
    %c0_35 = arith.constant 0 : index
    %65 = vector.load %arg10[%c0_34, %c0_35] : memref<16x16xf32, #tpu.memory_space<vmem>>, vector<16x16xf32>
    tpu.vector_store %arg10[%c0_34, %c0_35], %64 {strides = array<i32>} : memref<16x16xf32, #tpu.memory_space<vmem>>, vector<16x16xf32>,
    return
  }
  func.func @transform_0(%arg0: i32) -> (i32, i32) {
    %c0_i32 = arith.constant 0 : i32
    %c0_i32_0 = arith.constant 0 : i32
    return %arg0, %c0_i32 : i32, i32
  }
  func.func @transform_1(%arg0: i32) -> (i32, i32) {
    %c0_i32 = arith.constant 0 : i32
    %c0_i32_0 = arith.constant 0 : i32
    %c0_i32_1 = arith.constant 0 : i32
    return %c0_i32, %c0_i32_0 : i32, i32
  }
  func.func @transform_2(%arg0: i32) -> (i32, i32) {
    %c0_i32 = arith.constant 0 : i32
    %c0_i32_0 = arith.constant 0 : i32
    %c0_i32_1 = arith.constant 0 : i32
    return %c0_i32, %c0_i32_0 : i32, i32
  }
  func.func @transform_3(%arg0: i32) -> (i32, i32) {
    %c0_i32 = arith.constant 0 : i32
    %c0_i32_0 = arith.constant 0 : i32
    %c0_i32_1 = arith.constant 0 : i32
    return %c0_i32, %c0_i32_0 : i32, i32
  }
  func.func @transform_4(%arg0: i32) -> (i32, i32) {
    %c0_i32 = arith.constant 0 : i32
    %c0_i32_0 = arith.constant 0 : i32
    %c0_i32_1 = arith.constant 0 : i32
    return %c0_i32, %c0_i32_0 : i32, i32
  }
  func.func @transform_5(%arg0: i32) -> (i32, i32) {
    %c0_i32 = arith.constant 0 : i32
    %c0_i32_0 = arith.constant 0 : i32
    %c0_i32_1 = arith.constant 0 : i32
    return %c0_i32, %c0_i32_0 : i32, i32
  }
  func.func @transform_6(%arg0: i32) -> (i32, i32) {
    %c0_i32 = arith.constant 0 : i32
    %c0_i32_0 = arith.constant 0 : i32
    %c0_i32_1 = arith.constant 0 : i32
    return %c0_i32, %c0_i32_0 : i32, i32
  }
  func.func @transform_7(%arg0: i32) -> (i32, i32, i32) {
    %c0_i32 = arith.constant 0 : i32
    %c0_i32_0 = arith.constant 0 : i32
    %c0_i32_1 = arith.constant 0 : i32
    %c0_i32_2 = arith.constant 0 : i32
    return %c0_i32, %c0_i32_0, %c0_i32_1 : i32, i32, i32
  }
  func.func @transform_8(%arg0: i32) -> (i32, i32) {
    %c0_i32 = arith.constant 0 : i32
    %c0_i32_0 = arith.constant 0 : i32
    %c0_i32_1 = arith.constant 0 : i32
    return %c0_i32, %c0_i32_0 : i32, i32
  }
  func.func @transform_9(%arg0: i32) -> (i32, i32) {
    %c0_i32 = arith.constant 0 : i32
    %c0_i32_0 = arith.constant 0 : i32
    return %arg0, %c0_i32 : i32, i32
  }
}

</mosaic_0001>

<bundles_post_ra>
// kernel: tpu_custom_call.1
= control target key start
LH: loop header
LB: loop body
LE: loop exit
PB: predicated region body
PF: predicated region fallthrough
CT: control target
= control target key end

     0   :  { %14 = vsyncpa [#allocation3], 0  ;;  %s1562_s0 = inlined_call_operand.vmem [shape: f32[16,16], index: 0, kind: input, shape index: {}]   ;;  %s1563_s1 = inlined_call_operand.hbm [shape: f32[16,32], index: 1, kind: input, shape index: {}]   ;;  %s1564_s2 = inlined_call_operand.vmem [shape: f32[1,32], index: 2, kind: input, shape index: {}]   ;;  %s1565_s3 = inlined_call_operand.vmem [shape: f32[16,8], index: 3, kind: input, shape index: {}]   ;;  %s1566_s4 = inlined_call_operand.vmem [shape: f32[1,8], index: 4, kind: input, shape index: {}]   ;;  %s1567_s5 = inlined_call_operand.vmem [shape: f32[16,8], index: 5, kind: input, shape index: {}]   ;;  %s1568_s6 = inlined_call_operand.vmem [shape: f32[1,8], index: 6, kind: input, shape index: {}]   ;;  %s1569_s7 = inlined_call_operand.vmem [shape: f32[4,8,16], index: 7, kind: input, shape index: {}]   ;;  %s1570_s8 = inlined_call_operand.vmem [shape: f32[1,16], index: 8, kind: input, shape index: {}]   ;;  %s1571_s9 = inlined_call_operand.hbm [shape: f32[16,16], index: 9, kind: output, shape index: {}]  }
   0x1   :  { %15 = vsyncpa [#allocation4], 0  ;;  %s1399_s30 = smov [#allocation2]  }
   0x2   :  { %s23_s10 = sshll.u32 %s1399_s30, 4  ;;  %s24_s10 = int_to_ptr.vmem [resolvable:$true] %s23_s10 }
   0x3   :  { %s1363_s11 = scalar_lea.vmem %s24_s10, 256  ;;  %p1368_p1 = scmp.lt.s32.totalorder %s24_s10, %s24_s10 }
   0x4   :  { %p1364_p0 = scmp.ne.s32.totalorder %s24_s10, %s1363_s11  ;;  %p1369_p2 = scmp.lt.s32.totalorder %s1363_s11, %s1363_s11 }
   0x6   :  { %p1370_p3 = por %p1369_p2, %p1368_p1 }
   0x8   :  { %p1371_p4 = pnand %p1370_p3, %p1364_p0 }
   0xa   :  { %1374 = shalt.err (!%p1371_p4)
}
   0xb   :  { %s1400_s12 = smov 128   ;;  %s1401_s13 = smov 8  }
   0xc   :  { %29 = dma.hbm_to_vmem [thread:$0]  %s1563_s1, 256, %s24_s10, [#allocation3], %s1400_s12, %s1400_s12, %s1401_s13  }
   0xd   :  { %1395 = dma.done.wait [#allocation3], 256  }
   0xe   :  { %1396 = vsyncadd [#allocation3], 4294967040  ;;  %vm58_vm0 = vcmask 130048   ;;  %v50_v0 = vld [vmem:[#allocation2 + $0x8] sm:$0xff]  ;;  %v49_v1 = vld [vmem:[#allocation2] sm:$0xff]  ;;  %vm322_vm1 = vcmask 64512  }
   0xf   :  { %v47_v2 = vld [vmem:[%s1562_s0] sm:$0xff]  ;;  %1243 = vmatprep.subr.mxu0 %v50_v0  ;;  %v141_v3 = vld [vmem:[%s1565_s3 + $0x8] sm:$0xff]  ;;  %s1402_s29 = smov 112   ;;  %s1405_s20 = smov [#allocation5]  }
  0x10   :  { %1247 = vmatprep.mubr.msk.f32.mxu0 %vm58_vm0, %v47_v2  ;;  %v140_v4 = vld [vmem:[%s1565_s3] sm:$0xff]  ;;  %1244 = vmatpush3.msra.mxu0 %v50_v0  ;;  %v48_v5 = vld [vmem:[%s1562_s0 + $0x8] sm:$0xff]  ;;  %s1148_s21 = sshll.u32 %s1405_s20, 4  ;;  %s1149_s21 = int_to_ptr.vmem [resolvable:$true] %s1148_s21 }
  0x11   :  { %1250 = vmatprep.subr.mxu1 %v141_v3  ;;  %1245 = vmatprep.subr.mxu0 %v49_v1  ;;  %v225_v6 = vld [vmem:[%s1567_s5 + $0x8] sm:$0xff]  ;;  %v224_v7 = vld [vmem:[%s1567_s5] sm:$0xff]  ;;  %s1403_s5 = smov 120   ;;  %p1380_p6 = scmp.lt.s32.totalorder %s1149_s21, %s1149_s21 }
  0x12   :  { %1251 = vmatpush3.msra.mxu1 %v141_v3  ;;  %1246 = vmatpush3.msra.mxu0 %v49_v1  ;;  %v1160_v8 = vld [vmem:[%s1564_s2] ss:$0 sm:$0xff]  ;;  %s1404_s2 = smov 104  }
  0x13   :  { %1252 = vmatprep.subr.mxu1 %v140_v4  ;;  %1248 = vmatmul.mubr.msk.f32.vlgmr.msra.gmra.mxu0 %vm58_vm0, %v48_v5  ;;  %v1163_v10 = vld [vmem:[%s1566_s4] ss:$0 sm:$0xff] }
  0x14   :  { %1253 = vmatpush3.msra.mxu1 %v140_v4  ;;  %1254 = vmatprep.mubr.msk.f32.mxu1 %vm58_vm0, %v47_v2  ;;  %v1166_v18 = vld [vmem:[%s1568_s6] ss:$0 sm:$0xff] }
  0x15   :  { %1257 = vmatprep.subr.mxu0 %v225_v6  ;;  %1255 = vmatmul.mubr.msk.f32.vlgmr.msra.gmra.mxu1 %vm58_vm0, %v48_v5 }
  0x16   :  { %1258 = vmatpush3.msra.mxu0 %v225_v6  ;;  %1261 = vmatprep.mubr.msk.f32.mxu0 %vm58_vm0, %v47_v2 }
  0x17   :  { %1259 = vmatprep.subr.mxu0 %v224_v7 }
  0x18   :  { %1260 = vmatpush3.msra.mxu0 %v224_v7 }
  0x19   :  { %1262 = vmatmul.mubr.msk.f32.vlgmr.msra.gmra.mxu0 %vm58_vm0, %v48_v5 }
  0xd3   :  { %v1249_v9 = vpop.f32.mrf.mxu0 }
  0xd4   :  { %v137_v11 = vadd.f32 %v1249_v9, %v1160_v8 }
  0xd5   :  { %v131_v12 = vpop.f32.mrf.mxu0  ;;  %v1256_v13 = vpop.f32.mrf.mxu1 }
  0xd6   :  { %v132_v14 = vadd.f32 %v1160_v8, %v131_v12  ;;  %316 = vrot.lane.b32.xlu1 %v137_v11, %s1402_s29  ;;  %312 = vrot.lane.b32.xlu0 %v137_v11, %s1403_s5  ;;  %v221_v15 = vadd.f32 %v1256_v13, %v1163_v10 }
  0xd7   :  { %1274 = vmatprep.mubr.msk.f32.mxu0 %vm322_vm1, %v137_v11  ;;  %v215_v16 = vpop.f32.mrf.mxu1 }
  0xd8   :  { %1266 = vmatprep.mubr.msk.f32.mxu1 %vm322_vm1, %v132_v14  ;;  %v216_v17 = vadd.f32 %v1163_v10, %v215_v16  ;;  %1272 = vmatprep.subr.msk.mxu0 %vm322_vm1, %v221_v15 }
  0xd9   :  { %1273 = vmatpush3.xpose.msk.msra.mxu0 %vm322_vm1, %v221_v15  ;;  %v1263_v19 = vpop.f32.mrf.mxu0 }
  0xda   :  { %314 = vrot.lane.b32.xlu1 %v132_v14, %s1402_s29  ;;  %310 = vrot.lane.b32.xlu0 %v132_v14, %s1403_s5  ;;  %v305_v20 = vadd.f32 %v1263_v19, %v1166_v18 }
  0xdb   :  { %1264 = vmatprep.subr.msk.mxu1 %vm322_vm1, %v216_v17  ;;  %v299_v21 = vpop.f32.mrf.mxu0 }
  0xdc   :  { %1265 = vmatpush3.xpose.msk.msra.mxu1 %vm322_vm1, %v216_v17  ;;  %v300_v22 = vadd.f32 %v1166_v18, %v299_v21  ;;  %1288 = vmatprep.subr.mxu0 %v305_v20 }
  0xde   :  { %320 = vrot.lane.b32.xlu1 %v137_v11, %s1404_s2  ;;  %318 = vrot.lane.b32.xlu0 %v132_v14, %s1404_s2 }
  0xdf   :  { %1280 = vmatprep.subr.mxu1 %v300_v22 }
 0x148   :  { %v317_v23 = vpop.permute.xlu1 %316  ;;  %v313_v24 = vpop.permute.xlu0 %312 }
 0x149   :  { %1275 = vmatmul.mubr.msk.f32.vlgmr.msra.gmra.mxu0 %vm322_vm1, %v313_v24 }
 0x14a   :  { %1277 = vmatprep.mubr.msk.f32.mxu0 %vm322_vm1, %v317_v23  ;;  %1289 = vmatpush3.msra.mxu0 %v305_v20 }
 0x14c   :  { %v315_v25 = vpop.permute.xlu1 %314  ;;  %v311_v26 = vpop.permute.xlu0 %310 }
 0x14d   :  { %1267 = vmatmul.mubr.msk.f32.vlgmr.msra.gmra.mxu1 %vm322_vm1, %v311_v26 }
 0x14e   :  { %1269 = vmatprep.mubr.msk.f32.mxu1 %vm322_vm1, %v315_v25  ;;  %1281 = vmatpush3.msra.mxu1 %v300_v22 }
 0x150   :  { %v321_v27 = vpop.permute.xlu1 %320  ;;  %v319_v28 = vpop.permute.xlu0 %318 }
 0x151   :  { %1270 = vmatmul.mubr.msk.f32.gmra.mxu1 %vm322_vm1, %v319_v28  ;;  %1278 = vmatmul.mubr.msk.f32.gmra.mxu0 %vm322_vm1, %v321_v27 }
 0x209   :  { %v1276_v29 = vpop.f32.mrf.mxu0 }
 0x20a   :  { %v530_v30 = vsel %vm322_vm1, %v1276_v29, -inf }
 0x20b   :  { %v496_v31 = vpop.f32.mrf.mxu0  ;;  %531 = vmax.xlane.f32.xlu0 %v530_v30 }
 0x20c   :  { %v527_v33 = vsel %vm322_vm1, %v496_v31, -inf }
 0x20d   :  { %v1268_v32 = vpop.f32.mrf.mxu1 }
 0x20e   :  { %v518_v34 = vsel %vm322_vm1, %v1268_v32, -inf }
 0x20f   :  { %528 = vmax.xlane.f32.xlu0 %v527_v33  ;;  %519 = vmax.xlane.f32.xlu1 %v518_v34  ;;  %v400_v35 = vpop.f32.mrf.mxu1 }
 0x210   :  { %v515_v38 = vsel %vm322_vm1, %v400_v35, -inf }
 0x211   :  { %v1271_v36 = vpop.f32.mrf.mxu1  ;;  %v1279_v37 = vpop.f32.mrf.mxu0 }
 0x212   :  { %v524_v42 = vsel %vm322_vm1, %v1271_v36, -inf  ;;  %v536_v44 = vsel %vm322_vm1, %v1279_v37, -inf }
 0x213   :  { %516 = vmax.xlane.f32.xlu0 %v515_v38  ;;  %v410_v39 = vpop.f32.mrf.mxu1  ;;  %v506_v41 = vpop.f32.mrf.mxu0 }
 0x214   :  { %v521_v40 = vsel %vm322_vm1, %v410_v39, -inf  ;;  %v533_v43 = vsel %vm322_vm1, %v506_v41, -inf }
 0x215   :  { %522 = vmax.xlane.f32.xlu1 %v521_v40 }
 0x217   :  { %525 = vmax.xlane.f32.xlu0 %v524_v42 }
 0x219   :  { %534 = vmax.xlane.f32.xlu1 %v533_v43 }
 0x21b   :  { %537 = vmax.xlane.f32.xlu0 %v536_v44 }
 0x294   :  { %v532_v45 = vpop.xlane.xlu0 %531 }
 0x295   :  { %v544_v46 = vsub.f32 %v1276_v29, %v532_v45  ;;  %v797_v45 = vld [vmem:[%s1569_s7] sm:$0xff] }
 0x296   :  { %1296 = vmatprep.subr.mxu1 %v797_v45 }
 0x297   :  { %v557_v47 = vmul.f32 1.442695, %v544_v46  ;;  %v1190_v46 = vld [vmem:[%s1569_s7 + $0x8] sm:$0xff] }
 0x298   :  { %v529_v48 = vpop.xlane.xlu0 %528  ;;  %v520_v49 = vpop.xlane.xlu1 %519  ;;  %1301 = vmatprep.subr.mxu0 %v1190_v46 }
 0x299   :  { %1323 = vpow2.f32 %v557_v47  ;;  %v543_v50 = vsub.f32 %v496_v31, %v529_v48  ;;  %v540_v51 = vsub.f32 %v1268_v32, %v520_v49  ;;  %v1193_v47 = vld [vmem:[%s1569_s7 + $0x10] sm:$0xff]  ;;  %v1196_v48 = vld [vmem:[%s1569_s7 + $0x18] sm:$0xff] }
 0x29b   :  { %v555_v52 = vmul.f32 1.442695, %v543_v50  ;;  %v549_v53 = vmul.f32 1.442695, %v540_v51 }
 0x29c   :  { %v517_v54 = vpop.xlane.xlu0 %516 }
 0x29d   :  { %1325 = vpow2.f32 %v555_v52  ;;  %v539_v55 = vsub.f32 %v400_v35, %v517_v54 }
 0x29e   :  { %1327 = vpow2.f32 %v549_v53  ;;  %v523_v56 = vpop.xlane.xlu1 %522 }
 0x29f   :  { %v547_v57 = vmul.f32 1.442695, %v539_v55  ;;  %v541_v58 = vsub.f32 %v410_v39, %v523_v56 }
 0x2a0   :  { %v526_v59 = vpop.xlane.xlu0 %525 }
 0x2a1   :  { %1329 = vpow2.f32 %v547_v57  ;;  %v551_v60 = vmul.f32 1.442695, %v541_v58  ;;  %v542_v61 = vsub.f32 %v1271_v36, %v526_v59  ;;  %v1187_v58 = vld [vmem:[%s1570_s8] ss:$0 sm:$0xff]  ;;  %s1375_s8 = scalar_lea.vmem %s1149_s21, 256 }
 0x2a2   :  { %v535_v62 = vpop.xlane.xlu1 %534  ;;  %p1376_p5 = scmp.ne.s32.totalorder %s1149_s21, %s1375_s8  ;;  %p1381_p7 = scmp.lt.s32.totalorder %s1375_s8, %s1375_s8 }
 0x2a3   :  { %1331 = vpow2.f32 %v551_v60  ;;  %v553_v63 = vmul.f32 1.442695, %v542_v61  ;;  %v545_v0 = vsub.f32 %v506_v41, %v535_v62 }
 0x2a4   :  { %v538_v1 = vpop.xlane.xlu0 %537  ;;  %p1382_p8 = por %p1381_p7, %p1380_p6 }
 0x2a5   :  { %1333 = vpow2.f32 %v553_v63  ;;  %v559_v2 = vmul.f32 1.442695, %v545_v0  ;;  %v546_v3 = vsub.f32 %v1279_v37, %v538_v1 }
 0x2a6   :  { %v1324_v4 = vpop.eup %1323  ;;  %p1383_p9 = pnand %p1382_p8, %p1376_p5 }
 0x2a7   :  { %1335 = vpow2.f32 %v559_v2  ;;  %v561_v5 = vmul.f32 1.442695, %v546_v3  ;;  %v578_v6 = vsel %vm322_vm1, %v1324_v4, 0.0 }
 0x2a8   :  { %579 = vadd.xlane.f32.xlu0 %v578_v6 }
 0x2a9   :  { %1337 = vpow2.f32 %v561_v5 }
 0x2aa   :  { %v1326_v7 = vpop.eup %1325 }
 0x2ab   :  { %v1328_v8 = vpop.eup %1327  ;;  %v575_v9 = vsel %vm322_vm1, %v1326_v7, 0.0 }
 0x2ac   :  { %v566_v10 = vsel %vm322_vm1, %v1328_v8, 0.0  ;;  %576 = vadd.xlane.f32.xlu1 %v575_v9 }
 0x2ad   :  { %567 = vadd.xlane.f32.xlu0 %v566_v10 }
 0x2ae   :  { %v1330_v11 = vpop.eup %1329 }
 0x2af   :  { %v563_v12 = vsel %vm322_vm1, %v1330_v11, 0.0 }
 0x2b0   :  { %v1332_v13 = vpop.eup %1331  ;;  %564 = vadd.xlane.f32.xlu1 %v563_v12 }
 0x2b1   :  { %v569_v16 = vsel %vm322_vm1, %v1332_v13, 0.0 }
 0x2b2   :  { %v1334_v14 = vpop.eup %1333 }
 0x2b3   :  { %v572_v15 = vsel %vm322_vm1, %v1334_v14, 0.0 }
 0x2b4   :  { %v1336_v17 = vpop.eup %1335  ;;  %573 = vadd.xlane.f32.xlu0 %v572_v15  ;;  %570 = vadd.xlane.f32.xlu1 %v569_v16 }
 0x2b5   :  { %v581_v20 = vsel %vm322_vm1, %v1336_v17, 0.0 }
 0x2b6   :  { %v1338_v18 = vpop.eup %1337 }
 0x2b7   :  { %v584_v19 = vsel %vm322_vm1, %v1338_v18, 0.0 }
 0x2b8   :  { %585 = vadd.xlane.f32.xlu0 %v584_v19  ;;  %582 = vadd.xlane.f32.xlu1 %v581_v20 }
 0x331   :  { %v580_v21 = vpop.xlane.xlu0 %579 }
 0x332   :  { %1339 = vrcp.f32 %v580_v21 }
 0x335   :  { %v577_v22 = vpop.xlane.xlu1 %576 }
 0x336   :  { %v568_v23 = vpop.xlane.xlu0 %567  ;;  %1341 = vrcp.f32 %v577_v22 }
 0x337   :  { %1343 = vrcp.f32 %v568_v23 }
 0x339   :  { %v565_v24 = vpop.xlane.xlu1 %564 }
 0x33a   :  { %1345 = vrcp.f32 %v565_v24 }
 0x33d   :  { %v574_v25 = vpop.xlane.xlu0 %573  ;;  %v571_v26 = vpop.xlane.xlu1 %570 }
 0x33e   :  { %1347 = vrcp.f32 %v574_v25 }
 0x33f   :  { %1349 = vrcp.f32 %v571_v26  ;;  %v1340_v29 = vpop.eup %1339 }
 0x340   :  { %v600_v32 = vmul.f32 %v1340_v29, %v1324_v4 }
 0x341   :  { %v586_v27 = vpop.xlane.xlu0 %585  ;;  %v583_v28 = vpop.xlane.xlu1 %582 }
 0x342   :  { %1351 = vrcp.f32 %v586_v27 }
 0x343   :  { %v1342_v30 = vpop.eup %1341  ;;  %1353 = vrcp.f32 %v583_v28 }
 0x344   :  { %v599_v31 = vmul.f32 %v1342_v30, %v1326_v7  ;;  %v1344_v33 = vpop.eup %1343 }
 0x345   :  { %v596_v36 = vmul.f32 %v1344_v33, %v1328_v8 }
 0x346   :  { %1290 = vmatprep.mubr.msk.f32.mxu0 %vm322_vm1, %v599_v31 }
 0x347   :  { %v1346_v34 = vpop.eup %1345  ;;  %1291 = vmatmul.mubr.msk.f32.vlgmr.msra.gmra.mxu0 %vm322_vm1, %v600_v32 }
 0x348   :  { %v595_v35 = vmul.f32 %v1346_v34, %v1330_v11  ;;  %1302 = vmatpush3.msra.mxu0 %v1190_v46 }
 0x349   :  { %1311 = vmatprep.subr.mxu0 %v1196_v48 }
 0x34a   :  { %1282 = vmatprep.mubr.msk.f32.mxu1 %vm322_vm1, %v595_v35 }
 0x34b   :  { %v1348_v37 = vpop.eup %1347  ;;  %1283 = vmatmul.mubr.msk.f32.vlgmr.msra.gmra.mxu1 %vm322_vm1, %v596_v36 }
 0x34c   :  { %v1350_v38 = vpop.eup %1349  ;;  %v598_v39 = vmul.f32 %v1348_v37, %v1334_v14  ;;  %1297 = vmatpush3.msra.mxu1 %v797_v45 }
 0x34d   :  { %v597_v40 = vmul.f32 %v1350_v38, %v1332_v13  ;;  %1306 = vmatprep.subr.mxu1 %v1193_v47 }
 0x34f   :  { %v1352_v41 = vpop.eup %1351  ;;  %1285 = vmatprep.mubr.msk.f32.mxu1 %vm322_vm1, %v597_v40 }
 0x350   :  { %v1354_v42 = vpop.eup %1353  ;;  %1286 = vmatmul.mubr.msk.f32.gmra.mxu1 %vm322_vm1, %v598_v39  ;;  %v602_v43 = vmul.f32 %v1352_v41, %v1338_v18 }
 0x351   :  { %v601_v44 = vmul.f32 %v1354_v42, %v1336_v17 }
 0x353   :  { %1293 = vmatprep.mubr.msk.f32.mxu0 %vm322_vm1, %v601_v44 }
 0x354   :  { %1294 = vmatmul.mubr.msk.f32.gmra.mxu0 %vm322_vm1, %v602_v43 }
 0x407   :  { %v1292_v49 = vpop.f32.mrf.mxu0 }
 0x409   :  { %v778_v52 = vpop.f32.mrf.mxu0 }
 0x40b   :  { %v1284_v50 = vpop.f32.mrf.mxu1 }
 0x40c   :  { %1303 = vmatprep.mubr.msk.f32.mxu0 %vm322_vm1, %v1284_v50 }
 0x40d   :  { %v681_v51 = vpop.f32.mrf.mxu1  ;;  %1304 = vmatmul.mubr.msk.f32.vlgmr.msra.gmra.mxu0 %vm322_vm1, %v1292_v49 }
 0x40e   :  { %1298 = vmatprep.mubr.msk.f32.mxu1 %vm322_vm1, %v681_v51  ;;  %1312 = vmatpush3.msra.mxu0 %v1196_v48 }
 0x40f   :  { %1299 = vmatmul.mubr.msk.f32.vlgmr.msra.gmra.mxu1 %vm322_vm1, %v778_v52 }
 0x410   :  { %v1287_v53 = vpop.f32.mrf.mxu1  ;;  %1307 = vmatpush3.msra.mxu1 %v1193_v47 }
 0x411   :  { %1313 = vmatprep.mubr.msk.f32.mxu0 %vm322_vm1, %v1287_v53 }
 0x412   :  { %v691_v54 = vpop.f32.mrf.mxu1 }
 0x413   :  { %1308 = vmatprep.mubr.msk.f32.mxu1 %vm322_vm1, %v691_v54 }
 0x414   :  { %v1295_v55 = vpop.f32.mrf.mxu0 }
 0x415   :  { %1314 = vmatmul.mubr.msk.f32.vlgmr.msra.gmra.mxu0 %vm322_vm1, %v1295_v55 }
 0x416   :  { %v788_v56 = vpop.f32.mrf.mxu0 }
 0x417   :  { %1309 = vmatmul.mubr.msk.f32.vlgmr.msra.gmra.mxu1 %vm322_vm1, %v788_v56 }
 0x4cd   :  { %v1305_v59 = vpop.f32.mrf.mxu0 }
 0x4cf   :  { %v1300_v57 = vpop.f32.mrf.mxu1  ;;  %v960_v63 = vpop.f32.mrf.mxu0 }
 0x4d0   :  { %v883_v61 = vadd.f32 %v1300_v57, %v1187_v58 }
 0x4d1   :  { %v877_v60 = vpop.f32.mrf.mxu1 }
 0x4d2   :  { %v878_v62 = vadd.f32 %v1187_v58, %v877_v60  ;;  %v970_v0 = vadd.f32 %v1305_v59, %v883_v61 }
 0x4d4   :  { %v969_v4 = vadd.f32 %v960_v63, %v878_v62 }
 0x4d5   :  { %v1315_v1 = vpop.f32.mrf.mxu0 }
 0x4d7   :  { %v1310_v2 = vpop.f32.mrf.mxu1  ;;  %v1130_v8 = vpop.f32.mrf.mxu0 }
 0x4d8   :  { %v1055_v3 = vadd.f32 %v1310_v2, %v970_v0 }
 0x4d9   :  { %v1045_v5 = vpop.f32.mrf.mxu1 }
 0x4da   :  { %v1140_v6 = vadd.f32 %v1315_v1, %v1055_v3  ;;  %v1054_v7 = vadd.f32 %v1045_v5, %v969_v4 }
 0x4dc   :  { %1142 = vst.msk [vmem:[#allocation5 + $0x8] sm:$0xff] %vm58_vm0, %v1140_v6  ;;  %v1139_v9 = vadd.f32 %v1130_v8, %v1054_v7 }
 0x4de   :  { %1141 = vst.msk [vmem:[#allocation5] sm:$0xff] %vm58_vm0, %v1139_v9 }
 0x4df   :  { %1386 = shalt.err (!%p1383_p9)
}
 0x4e0   :  { %1154 = dma.vmem_to_hbm [thread:$0]  %s1149_s21, 256, %s1571_s9, [#allocation4], %s1400_s12, %s1400_s12, %s1401_s13  }
 0x4e1   :  { %1397 = dma.done.wait [#allocation4], 256  }
 0x4e2   :  { %1398 = vsyncadd [#allocation4], 4294967040 }
 0x4e3   :  { %1158 = vsyncpa [#allocation3], 1 }
 0x4e4   :  { %1159 = vsyncpa [#allocation4], 1 }

// kernel: tpu_custom_call.1
= control target key start
LH: loop header
LB: loop body
LE: loop exit
PB: predicated region body
PF: predicated region fallthrough
CT: control target
= control target key end

     0   :  { %14 = vsyncpa [#allocation3], 0  ;;  %s1562_s0 = inlined_call_operand.vmem [shape: f32[16,16], index: 0, kind: input, shape index: {}]   ;;  %s1563_s1 = inlined_call_operand.hbm [shape: f32[16,32], index: 1, kind: input, shape index: {}]   ;;  %s1564_s2 = inlined_call_operand.vmem [shape: f32[1,32], index: 2, kind: input, shape index: {}]   ;;  %s1565_s3 = inlined_call_operand.vmem [shape: f32[16,8], index: 3, kind: input, shape index: {}]   ;;  %s1566_s4 = inlined_call_operand.vmem [shape: f32[1,8], index: 4, kind: input, shape index: {}]   ;;  %s1567_s5 = inlined_call_operand.vmem [shape: f32[16,8], index: 5, kind: input, shape index: {}]   ;;  %s1568_s6 = inlined_call_operand.vmem [shape: f32[1,8], index: 6, kind: input, shape index: {}]   ;;  %s1569_s7 = inlined_call_operand.vmem [shape: f32[4,8,16], index: 7, kind: input, shape index: {}]   ;;  %s1570_s8 = inlined_call_operand.vmem [shape: f32[1,16], index: 8, kind: input, shape index: {}]   ;;  %s1571_s9 = inlined_call_operand.hbm [shape: f32[16,16], index: 9, kind: output, shape index: {}]  }
   0x1   :  { %15 = vsyncpa [#allocation4], 0  ;;  %s1399_s30 = smov [#allocation2]  }
   0x2   :  { %s23_s10 = sshll.u32 %s1399_s30, 4  ;;  %s24_s10 = int_to_ptr.vmem [resolvable:$true] %s23_s10 }
   0x3   :  { %s1363_s11 = scalar_lea.vmem %s24_s10, 256  ;;  %p1368_p1 = scmp.lt.s32.totalorder %s24_s10, %s24_s10 }
   0x4   :  { %p1364_p0 = scmp.ne.s32.totalorder %s24_s10, %s1363_s11  ;;  %p1369_p2 = scmp.lt.s32.totalorder %s1363_s11, %s1363_s11 }
   0x6   :  { %p1370_p3 = por %p1369_p2, %p1368_p1 }
   0x8   :  { %p1371_p4 = pnand %p1370_p3, %p1364_p0 }
   0xa   :  { %1374 = shalt.err (!%p1371_p4)
}
   0xb   :  { %s1400_s12 = smov 128   ;;  %s1401_s13 = smov 8  }
   0xc   :  { %29 = dma.hbm_to_vmem [thread:$0]  %s1563_s1, 256, %s24_s10, [#allocation3], %s1400_s12, %s1400_s12, %s1401_s13  }
   0xd   :  { %1395 = dma.done.wait [#allocation3], 256  }
   0xe   :  { %1396 = vsyncadd [#allocation3], 4294967040  ;;  %vm58_vm0 = vcmask 130048   ;;  %v50_v0 = vld [vmem:[#allocation2 + $0x8] sm:$0xff]  ;;  %v49_v1 = vld [vmem:[#allocation2] sm:$0xff]  ;;  %vm322_vm1 = vcmask 64512  }
   0xf   :  { %v47_v2 = vld [vmem:[%s1562_s0] sm:$0xff]  ;;  %1243 = vmatprep.subr.mxu0 %v50_v0  ;;  %v141_v3 = vld [vmem:[%s1565_s3 + $0x8] sm:$0xff]  ;;  %s1402_s29 = smov 112   ;;  %s1405_s20 = smov [#allocation5]  }
  0x10   :  { %1247 = vmatprep.mubr.msk.f32.mxu0 %vm58_vm0, %v47_v2  ;;  %v140_v4 = vld [vmem:[%s1565_s3] sm:$0xff]  ;;  %1244 = vmatpush3.msra.mxu0 %v50_v0  ;;  %v48_v5 = vld [vmem:[%s1562_s0 + $0x8] sm:$0xff]  ;;  %s1148_s21 = sshll.u32 %s1405_s20, 4  ;;  %s1149_s21 = int_to_ptr.vmem [resolvable:$true] %s1148_s21 }
  0x11   :  { %1250 = vmatprep.subr.mxu1 %v141_v3  ;;  %1245 = vmatprep.subr.mxu0 %v49_v1  ;;  %v225_v6 = vld [vmem:[%s1567_s5 + $0x8] sm:$0xff]  ;;  %v224_v7 = vld [vmem:[%s1567_s5] sm:$0xff]  ;;  %s1403_s5 = smov 120   ;;  %p1380_p6 = scmp.lt.s32.totalorder %s1149_s21, %s1149_s21 }
  0x12   :  { %1251 = vmatpush3.msra.mxu1 %v141_v3  ;;  %1246 = vmatpush3.msra.mxu0 %v49_v1  ;;  %v1160_v8 = vld [vmem:[%s1564_s2] ss:$0 sm:$0xff]  ;;  %s1404_s2 = smov 104  }
  0x13   :  { %1252 = vmatprep.subr.mxu1 %v140_v4  ;;  %1248 = vmatmul.mubr.msk.f32.vlgmr.msra.gmra.mxu0 %vm58_vm0, %v48_v5  ;;  %v1163_v10 = vld [vmem:[%s1566_s4] ss:$0 sm:$0xff] }
  0x14   :  { %1253 = vmatpush3.msra.mxu1 %v140_v4  ;;  %1254 = vmatprep.mubr.msk.f32.mxu1 %vm58_vm0, %v47_v2  ;;  %v1166_v18 = vld [vmem:[%s1568_s6] ss:$0 sm:$0xff] }
  0x15   :  { %1257 = vmatprep.subr.mxu0 %v225_v6  ;;  %1255 = vmatmul.mubr.msk.f32.vlgmr.msra.gmra.mxu1 %vm58_vm0, %v48_v5 }
  0x16   :  { %1258 = vmatpush3.msra.mxu0 %v225_v6  ;;  %1261 = vmatprep.mubr.msk.f32.mxu0 %vm58_vm0, %v47_v2 }
  0x17   :  { %1259 = vmatprep.subr.mxu0 %v224_v7 }
  0x18   :  { %1260 = vmatpush3.msra.mxu0 %v224_v7 }
  0x19   :  { %1262 = vmatmul.mubr.msk.f32.vlgmr.msra.gmra.mxu0 %vm58_vm0, %v48_v5 }
  0xd3   :  { %v1249_v9 = vpop.f32.mrf.mxu0 }
  0xd4   :  { %v137_v11 = vadd.f32 %v1249_v9, %v1160_v8 }
  0xd5   :  { %v131_v12 = vpop.f32.mrf.mxu0  ;;  %v1256_v13 = vpop.f32.mrf.mxu1 }
  0xd6   :  { %v132_v14 = vadd.f32 %v1160_v8, %v131_v12  ;;  %316 = vrot.lane.b32.xlu1 %v137_v11, %s1402_s29  ;;  %312 = vrot.lane.b32.xlu0 %v137_v11, %s1403_s5  ;;  %v221_v15 = vadd.f32 %v1256_v13, %v1163_v10 }
  0xd7   :  { %1274 = vmatprep.mubr.msk.f32.mxu0 %vm322_vm1, %v137_v11  ;;  %v215_v16 = vpop.f32.mrf.mxu1 }
  0xd8   :  { %1266 = vmatprep.mubr.msk.f32.mxu1 %vm322_vm1, %v132_v14  ;;  %v216_v17 = vadd.f32 %v1163_v10, %v215_v16  ;;  %1272 = vmatprep.subr.msk.mxu0 %vm322_vm1, %v221_v15 }
  0xd9   :  { %1273 = vmatpush3.xpose.msk.msra.mxu0 %vm322_vm1, %v221_v15  ;;  %v1263_v19 = vpop.f32.mrf.mxu0 }
  0xda   :  { %314 = vrot.lane.b32.xlu1 %v132_v14, %s1402_s29  ;;  %310 = vrot.lane.b32.xlu0 %v132_v14, %s1403_s5  ;;  %v305_v20 = vadd.f32 %v1263_v19, %v1166_v18 }
  0xdb   :  { %1264 = vmatprep.subr.msk.mxu1 %vm322_vm1, %v216_v17  ;;  %v299_v21 = vpop.f32.mrf.mxu0 }
  0xdc   :  { %1265 = vmatpush3.xpose.msk.msra.mxu1 %vm322_vm1, %v216_v17  ;;  %v300_v22 = vadd.f32 %v1166_v18, %v299_v21  ;;  %1288 = vmatprep.subr.mxu0 %v305_v20 }
  0xde   :  { %320 = vrot.lane.b32.xlu1 %v137_v11, %s1404_s2  ;;  %318 = vrot.lane.b32.xlu0 %v132_v14, %s1404_s2 }
  0xdf   :  { %1280 = vmatprep.subr.mxu1 %v300_v22 }
 0x148   :  { %v317_v23 = vpop.permute.xlu1 %316  ;;  %v313_v24 = vpop.permute.xlu0 %312 }
 0x149   :  { %1275 = vmatmul.mubr.msk.f32.vlgmr.msra.gmra.mxu0 %vm322_vm1, %v313_v24 }
 0x14a   :  { %1277 = vmatprep.mubr.msk.f32.mxu0 %vm322_vm1, %v317_v23  ;;  %1289 = vmatpush3.msra.mxu0 %v305_v20 }
 0x14c   :  { %v315_v25 = vpop.permute.xlu1 %314  ;;  %v311_v26 = vpop.permute.xlu0 %310 }
 0x14d   :  { %1267 = vmatmul.mubr.msk.f32.vlgmr.msra.gmra.mxu1 %vm322_vm1, %v311_v26 }
 0x14e   :  { %1269 = vmatprep.mubr.msk.f32.mxu1 %vm322_vm1, %v315_v25  ;;  %1281 = vmatpush3.msra.mxu1 %v300_v22 }
 0x150   :  { %v321_v27 = vpop.permute.xlu1 %320  ;;  %v319_v28 = vpop.permute.xlu0 %318 }
 0x151   :  { %1270 = vmatmul.mubr.msk.f32.gmra.mxu1 %vm322_vm1, %v319_v28  ;;  %1278 = vmatmul.mubr.msk.f32.gmra.mxu0 %vm322_vm1, %v321_v27 }
 0x209   :  { %v1276_v29 = vpop.f32.mrf.mxu0 }
 0x20a   :  { %v530_v30 = vsel %vm322_vm1, %v1276_v29, -inf }
 0x20b   :  { %v496_v31 = vpop.f32.mrf.mxu0  ;;  %531 = vmax.xlane.f32.xlu0 %v530_v30 }
 0x20c   :  { %v527_v33 = vsel %vm322_vm1, %v496_v31, -inf }
 0x20d   :  { %v1268_v32 = vpop.f32.mrf.mxu1 }
 0x20e   :  { %v518_v34 = vsel %vm322_vm1, %v1268_v32, -inf }
 0x20f   :  { %528 = vmax.xlane.f32.xlu0 %v527_v33  ;;  %519 = vmax.xlane.f32.xlu1 %v518_v34  ;;  %v400_v35 = vpop.f32.mrf.mxu1 }
 0x210   :  { %v515_v38 = vsel %vm322_vm1, %v400_v35, -inf }
 0x211   :  { %v1271_v36 = vpop.f32.mrf.mxu1  ;;  %v1279_v37 = vpop.f32.mrf.mxu0 }
 0x212   :  { %v524_v42 = vsel %vm322_vm1, %v1271_v36, -inf  ;;  %v536_v44 = vsel %vm322_vm1, %v1279_v37, -inf }
 0x213   :  { %516 = vmax.xlane.f32.xlu0 %v515_v38  ;;  %v410_v39 = vpop.f32.mrf.mxu1  ;;  %v506_v41 = vpop.f32.mrf.mxu0 }
 0x214   :  { %v521_v40 = vsel %vm322_vm1, %v410_v39, -inf  ;;  %v533_v43 = vsel %vm322_vm1, %v506_v41, -inf }
 0x215   :  { %522 = vmax.xlane.f32.xlu1 %v521_v40 }
 0x217   :  { %525 = vmax.xlane.f32.xlu0 %v524_v42 }
 0x219   :  { %534 = vmax.xlane.f32.xlu1 %v533_v43 }
 0x21b   :  { %537 = vmax.xlane.f32.xlu0 %v536_v44 }
 0x294   :  { %v532_v45 = vpop.xlane.xlu0 %531 }
 0x295   :  { %v544_v46 = vsub.f32 %v1276_v29, %v532_v45  ;;  %v797_v45 = vld [vmem:[%s1569_s7] sm:$0xff] }
 0x296   :  { %1296 = vmatprep.subr.mxu1 %v797_v45 }
 0x297   :  { %v557_v47 = vmul.f32 1.442695, %v544_v46  ;;  %v1190_v46 = vld [vmem:[%s1569_s7 + $0x8] sm:$0xff] }
 0x298   :  { %v529_v48 = vpop.xlane.xlu0 %528  ;;  %v520_v49 = vpop.xlane.xlu1 %519  ;;  %1301 = vmatprep.subr.mxu0 %v1190_v46 }
 0x299   :  { %1323 = vpow2.f32 %v557_v47  ;;  %v543_v50 = vsub.f32 %v496_v31, %v529_v48  ;;  %v540_v51 = vsub.f32 %v1268_v32, %v520_v49  ;;  %v1193_v47 = vld [vmem:[%s1569_s7 + $0x10] sm:$0xff]  ;;  %v1196_v48 = vld [vmem:[%s1569_s7 + $0x18] sm:$0xff] }
 0x29b   :  { %v555_v52 = vmul.f32 1.442695, %v543_v50  ;;  %v549_v53 = vmul.f32 1.442695, %v540_v51 }
 0x29c   :  { %v517_v54 = vpop.xlane.xlu0 %516 }
 0x29d   :  { %1325 = vpow2.f32 %v555_v52  ;;  %v539_v55 = vsub.f32 %v400_v35, %v517_v54 }
 0x29e   :  { %1327 = vpow2.f32 %v549_v53  ;;  %v523_v56 = vpop.xlane.xlu1 %522 }
 0x29f   :  { %v547_v57 = vmul.f32 1.442695, %v539_v55  ;;  %v541_v58 = vsub.f32 %v410_v39, %v523_v56 }
 0x2a0   :  { %v526_v59 = vpop.xlane.xlu0 %525 }
 0x2a1   :  { %1329 = vpow2.f32 %v547_v57  ;;  %v551_v60 = vmul.f32 1.442695, %v541_v58  ;;  %v542_v61 = vsub.f32 %v1271_v36, %v526_v59  ;;  %v1187_v58 = vld [vmem:[%s1570_s8] ss:$0 sm:$0xff]  ;;  %s1375_s8 = scalar_lea.vmem %s1149_s21, 256 }
 0x2a2   :  { %v535_v62 = vpop.xlane.xlu1 %534  ;;  %p1376_p5 = scmp.ne.s32.totalorder %s1149_s21, %s1375_s8  ;;  %p1381_p7 = scmp.lt.s32.totalorder %s1375_s8, %s1375_s8 }
 0x2a3   :  { %1331 = vpow2.f32 %v551_v60  ;;  %v553_v63 = vmul.f32 1.442695, %v542_v61  ;;  %v545_v0 = vsub.f32 %v506_v41, %v535_v62 }
 0x2a4   :  { %v538_v1 = vpop.xlane.xlu0 %537  ;;  %p1382_p8 = por %p1381_p7, %p1380_p6 }
 0x2a5   :  { %1333 = vpow2.f32 %v553_v63  ;;  %v559_v2 = vmul.f32 1.442695, %v545_v0  ;;  %v546_v3 = vsub.f32 %v1279_v37, %v538_v1 }
 0x2a6   :  { %v1324_v4 = vpop.eup %1323  ;;  %p1383_p9 = pnand %p1382_p8, %p1376_p5 }
 0x2a7   :  { %1335 = vpow2.f32 %v559_v2  ;;  %v561_v5 = vmul.f32 1.442695, %v546_v3  ;;  %v578_v6 = vsel %vm322_vm1, %v1324_v4, 0.0 }
 0x2a8   :  { %579 = vadd.xlane.f32.xlu0 %v578_v6 }
 0x2a9   :  { %1337 = vpow2.f32 %v561_v5 }
 0x2aa   :  { %v1326_v7 = vpop.eup %1325 }
 0x2ab   :  { %v1328_v8 = vpop.eup %1327  ;;  %v575_v9 = vsel %vm322_vm1, %v1326_v7, 0.0 }
 0x2ac   :  { %v566_v10 = vsel %vm322_vm1, %v1328_v8, 0.0  ;;  %576 = vadd.xlane.f32.xlu1 %v575_v9 }
 0x2ad   :  { %567 = vadd.xlane.f32.xlu0 %v566_v10 }
 0x2ae   :  { %v1330_v11 = vpop.eup %1329 }
 0x2af   :  { %v563_v12 = vsel %vm322_vm1, %v1330_v11, 0.0 }
 0x2b0   :  { %v1332_v13 = vpop.eup %1331  ;;  %564 = vadd.xlane.f32.xlu1 %v563_v12 }
 0x2b1   :  { %v569_v16 = vsel %vm322_vm1, %v1332_v13, 0.0 }
 0x2b2   :  { %v1334_v14 = vpop.eup %1333 }
 0x2b3   :  { %v572_v15 = vsel %vm322_vm1, %v1334_v14, 0.0 }
 0x2b4   :  { %v1336_v17 = vpop.eup %1335  ;;  %573 = vadd.xlane.f32.xlu0 %v572_v15  ;;  %570 = vadd.xlane.f32.xlu1 %v569_v16 }
 0x2b5   :  { %v581_v20 = vsel %vm322_vm1, %v1336_v17, 0.0 }
 0x2b6   :  { %v1338_v18 = vpop.eup %1337 }
 0x2b7   :  { %v584_v19 = vsel %vm322_vm1, %v1338_v18, 0.0 }
 0x2b8   :  { %585 = vadd.xlane.f32.xlu0 %v584_v19  ;;  %582 = vadd.xlane.f32.xlu1 %v581_v20 }
 0x331   :  { %v580_v21 = vpop.xlane.xlu0 %579 }
 0x332   :  { %1339 = vrcp.f32 %v580_v21 }
 0x335   :  { %v577_v22 = vpop.xlane.xlu1 %576 }
 0x336   :  { %v568_v23 = vpop.xlane.xlu0 %567  ;;  %1341 = vrcp.f32 %v577_v22 }
 0x337   :  { %1343 = vrcp.f32 %v568_v23 }
 0x339   :  { %v565_v24 = vpop.xlane.xlu1 %564 }
 0x33a   :  { %1345 = vrcp.f32 %v565_v24 }
 0x33d   :  { %v574_v25 = vpop.xlane.xlu0 %573  ;;  %v571_v26 = vpop.xlane.xlu1 %570 }
 0x33e   :  { %1347 = vrcp.f32 %v574_v25 }
 0x33f   :  { %1349 = vrcp.f32 %v571_v26  ;;  %v1340_v29 = vpop.eup %1339 }
 0x340   :  { %v600_v32 = vmul.f32 %v1340_v29, %v1324_v4 }
 0x341   :  { %v586_v27 = vpop.xlane.xlu0 %585  ;;  %v583_v28 = vpop.xlane.xlu1 %582 }
 0x342   :  { %1351 = vrcp.f32 %v586_v27 }
 0x343   :  { %v1342_v30 = vpop.eup %1341  ;;  %1353 = vrcp.f32 %v583_v28 }
 0x344   :  { %v599_v31 = vmul.f32 %v1342_v30, %v1326_v7  ;;  %v1344_v33 = vpop.eup %1343 }
 0x345   :  { %v596_v36 = vmul.f32 %v1344_v33, %v1328_v8 }
 0x346   :  { %1290 = vmatprep.mubr.msk.f32.mxu0 %vm322_vm1, %v599_v31 }
 0x347   :  { %v1346_v34 = vpop.eup %1345  ;;  %1291 = vmatmul.mubr.msk.f32.vlgmr.msra.gmra.mxu0 %vm322_vm1, %v600_v32 }
 0x348   :  { %v595_v35 = vmul.f32 %v1346_v34, %v1330_v11  ;;  %1302 = vmatpush3.msra.mxu0 %v1190_v46 }
 0x349   :  { %1311 = vmatprep.subr.mxu0 %v1196_v48 }
 0x34a   :  { %1282 = vmatprep.mubr.msk.f32.mxu1 %vm322_vm1, %v595_v35 }
 0x34b   :  { %v1348_v37 = vpop.eup %1347  ;;  %1283 = vmatmul.mubr.msk.f32.vlgmr.msra.gmra.mxu1 %vm322_vm1, %v596_v36 }
 0x34c   :  { %v1350_v38 = vpop.eup %1349  ;;  %v598_v39 = vmul.f32 %v1348_v37, %v1334_v14  ;;  %1297 = vmatpush3.msra.mxu1 %v797_v45 }
 0x34d   :  { %v597_v40 = vmul.f32 %v1350_v38, %v1332_v13  ;;  %1306 = vmatprep.subr.mxu1 %v1193_v47 }
 0x34f   :  { %v1352_v41 = vpop.eup %1351  ;;  %1285 = vmatprep.mubr.msk.f32.mxu1 %vm322_vm1, %v597_v40 }
 0x350   :  { %v1354_v42 = vpop.eup %1353  ;;  %1286 = vmatmul.mubr.msk.f32.gmra.mxu1 %vm322_vm1, %v598_v39  ;;  %v602_v43 = vmul.f32 %v1352_v41, %v1338_v18 }
 0x351   :  { %v601_v44 = vmul.f32 %v1354_v42, %v1336_v17 }
 0x353   :  { %1293 = vmatprep.mubr.msk.f32.mxu0 %vm322_vm1, %v601_v44 }
 0x354   :  { %1294 = vmatmul.mubr.msk.f32.gmra.mxu0 %vm322_vm1, %v602_v43 }
 0x407   :  { %v1292_v49 = vpop.f32.mrf.mxu0 }
 0x409   :  { %v778_v52 = vpop.f32.mrf.mxu0 }
 0x40b   :  { %v1284_v50 = vpop.f32.mrf.mxu1 }
 0x40c   :  { %1303 = vmatprep.mubr.msk.f32.mxu0 %vm322_vm1, %v1284_v50 }
 0x40d   :  { %v681_v51 = vpop.f32.mrf.mxu1  ;;  %1304 = vmatmul.mubr.msk.f32.vlgmr.msra.gmra.mxu0 %vm322_vm1, %v1292_v49 }
 0x40e   :  { %1298 = vmatprep.mubr.msk.f32.mxu1 %vm322_vm1, %v681_v51  ;;  %1312 = vmatpush3.msra.mxu0 %v1196_v48 }
 0x40f   :  { %1299 = vmatmul.mubr.msk.f32.vlgmr.msra.gmra.mxu1 %vm322_vm1, %v778_v52 }
 0x410   :  { %v1287_v53 = vpop.f32.mrf.mxu1  ;;  %1307 = vmatpush3.msra.mxu1 %v1193_v47 }
 0x411   :  { %1313 = vmatprep.mubr.msk.f32.mxu0 %vm322_vm1, %v1287_v53 }
 0x412   :  { %v691_v54 = vpop.f32.mrf.mxu1 }
 0x413   :  { %1308 = vmatprep.mubr.msk.f32.mxu1 %vm322_vm1, %v691_v54 }
 0x414   :  { %v1295_v55 = vpop.f32.mrf.mxu0 }
 0x415   :  { %1314 = vmatmul.mubr.msk.f32.vlgmr.msra.gmra.mxu0 %vm322_vm1, %v1295_v55 }
 0x416   :  { %v788_v56 = vpop.f32.mrf.mxu0 }
 0x417   :  { %1309 = vmatmul.mubr.msk.f32.vlgmr.msra.gmra.mxu1 %vm322_vm1, %v788_v56 }
 0x4cd   :  { %v1305_v59 = vpop.f32.mrf.mxu0 }
 0x4cf   :  { %v1300_v57 = vpop.f32.mrf.mxu1  ;;  %v960_v63 = vpop.f32.mrf.mxu0 }
 0x4d0   :  { %v883_v61 = vadd.f32 %v1300_v57, %v1187_v58 }
 0x4d1   :  { %v877_v60 = vpop.f32.mrf.mxu1 }
 0x4d2   :  { %v878_v62 = vadd.f32 %v1187_v58, %v877_v60  ;;  %v970_v0 = vadd.f32 %v1305_v59, %v883_v61 }
 0x4d4   :  { %v969_v4 = vadd.f32 %v960_v63, %v878_v62 }
 0x4d5   :  { %v1315_v1 = vpop.f32.mrf.mxu0 }
 0x4d7   :  { %v1310_v2 = vpop.f32.mrf.mxu1  ;;  %v1130_v8 = vpop.f32.mrf.mxu0 }
 0x4d8   :  { %v1055_v3 = vadd.f32 %v1310_v2, %v970_v0 }
 0x4d9   :  { %v1045_v5 = vpop.f32.mrf.mxu1 }
 0x4da   :  { %v1140_v6 = vadd.f32 %v1315_v1, %v1055_v3  ;;  %v1054_v7 = vadd.f32 %v1045_v5, %v969_v4 }
 0x4dc   :  { %1142 = vst.msk [vmem:[#allocation5 + $0x8] sm:$0xff] %vm58_vm0, %v1140_v6  ;;  %v1139_v9 = vadd.f32 %v1130_v8, %v1054_v7 }
 0x4de   :  { %1141 = vst.msk [vmem:[#allocation5] sm:$0xff] %vm58_vm0, %v1139_v9 }
 0x4df   :  { %1386 = shalt.err (!%p1383_p9)
}
 0x4e0   :  { %1154 = dma.vmem_to_hbm [thread:$0]  %s1149_s21, 256, %s1571_s9, [#allocation4], %s1400_s12, %s1400_s12, %s1401_s13  }
 0x4e1   :  { %1397 = dma.done.wait [#allocation4], 256  }
 0x4e2   :  { %1398 = vsyncadd [#allocation4], 4294967040 }
 0x4e3   :  { %1158 = vsyncpa [#allocation3], 1 }
 0x4e4   :  { %1159 = vsyncpa [#allocation4], 1 }

</bundles_post_ra>
